<compile_context>
chip_gen: v6e
topology: v6e:2x2x1
jax: 0.10.0
libtpu: 0.0.40
codegen_flags: <defaults>
</compile_context>

<pallas_src>
import functools

import jax
import jax.numpy as jnp
from jax.experimental import pallas as pl
from jax.experimental.pallas import tpu as pltpu

_EPS = 1e-5


def _silu(x):
    return x * jax.nn.sigmoid(x)


@functools.lru_cache(maxsize=None)
def _vmem_limit_bytes():
    """Per-generation VMEM budget: ~3/4 of physical (48 MiB v7x, 96 MiB v5e/v6e)."""
    cap = None
    get_info = getattr(pltpu, "get_tpu_info", None)
    if get_info is not None:
        try:
            cap = getattr(get_info(), "vmem_capacity_bytes", None)
        except Exception:
            cap = None
    if not cap:
        return 48 * 1024 * 1024           # safe default: fits v7x's 64 MiB physical VMEM
    return int(max(32 * 1024 * 1024, min(cap * 3 // 4, 100 * 1024 * 1024)))


def _compiler_params(semantics):
    return pltpu.CompilerParams(dimension_semantics=semantics,
                                vmem_limit_bytes=_vmem_limit_bytes())


def _pick_row_tile(n_rows, preferred=None):
    """Row tile: large (amortize ~0.35us/step), multiple of 8, divides n_rows."""
    if preferred is not None and n_rows % preferred == 0:
        return preferred
    for cand in (1024, 512, 256, 128, 64, 32, 16, 8):
        if n_rows % cand == 0:
            return cand
    # TODO(synk): masked-tail path for awkward row counts; fall back to the largest
    # multiple-of-8 divisor, else the full extent (full-dim blocks are layout-legal).
    for d in range((min(n_rows, 2048) // 8) * 8, 0, -8):
        if n_rows % d == 0:
            return d
    return n_rows


def _pick_h_tile(H, W, C, pad, act_bytes):
    """Largest H tile (divisor of H, multiple of pad) whose per-step footprint fits VMEM."""
    budget = min(_vmem_limit_bytes() // 4, 12 * 1024 * 1024)
    valid = [th for th in range(H, 0, -1) if H % th == 0 and th % pad == 0]
    assert valid, "H-tiling needs a tile size that is a multiple of the halo pad"
    for th in valid:
        rows = th + 2 * pad
        est = (rows * W * C * act_bytes * 2            # main input block (double buffered)
               + 2 * pad * W * C * act_bytes * 2       # halo blocks
               + th * W * C * act_bytes * 2            # output block
               + rows * (W + 24) * C * act_bytes       # padded scratch
               + th * W * C * 16)                      # f32 accumulator + elementwise temps
        if est <= budget:
            return th
    return valid[-1]


def _combine_stats(stats, n_per_tile):
    """Chan combine of per-tile (mean, centered M2) rows -> global (mu, biased var)."""
    means = stats[:, 0, :].astype(jnp.float32)            # (T, C)
    m2s = stats[:, 1, :].astype(jnp.float32)              # (T, C)
    n_tiles = stats.shape[0]
    mu = jnp.mean(means, axis=0)                          # equal counts per tile
    m2 = jnp.sum(m2s, axis=0) + n_per_tile * jnp.sum((means - mu[None, :]) ** 2, axis=0)
    var = m2 / (n_per_tile * n_tiles)
    return mu, var


def _bn_affine(mu, var, gamma, beta):
    """Fold train-mode BN into y*a + c.  Returns (2, C) f32 rows [a; c]."""
    a = gamma.reshape(-1) * jax.lax.rsqrt(var + _EPS)
    c = beta.reshape(-1) - mu * a
    return jnp.stack([a, c], axis=0).astype(jnp.float32)


# --------------------------------------------------------------------------------------
# Kernel A: 1x1 expansion conv as row-tiled matmul; emits raw output + per-tile BN1 stats.
# BN1 normalize + SiLU are deferred into kernel B (saves a full read+write of y1).
# --------------------------------------------------------------------------------------
def _pw1_kernel(x_ref, w_ref, y_ref, st_ref):
    y = jnp.dot(x_ref[...], w_ref[...], preferred_element_type=jnp.float32)  # (tm, Cexp) f32
    y_store = y.astype(y_ref.dtype)
    y_ref[...] = y_store
    v = y_store.astype(jnp.float32)                        # stats from the stored values
    m = jnp.sum(v, axis=0, keepdims=True) * (1.0 / v.shape[0])
    d = v - m
    st_ref[0:1, :] = m
    st_ref[1:2, :] = jnp.sum(d * d, axis=0, keepdims=True)


def pw_conv1(x2d, w1, *, row_tile, out_dtype):
    m_rows, cin = x2d.shape
    cexp = w1.shape[1]
    n_tiles = m_rows // row_tile
    flops = 2 * m_rows * cin * cexp
    bytes_accessed = (x2d.size * x2d.dtype.itemsize + w1.size * w1.dtype.itemsize
                      + m_rows * cexp * jnp.dtype(out_dtype).itemsize)
    # TODO(synk): stages with Cexp < 128 lanes (< 256 for the v6e/v7x MXU width) would
    # benefit from a channel-padded or spatial-on-lane layout; kept channels-minor here.
    return pl.pallas_call(
        _pw1_kernel,
        grid=(n_tiles,),
        in_specs=[
            pl.BlockSpec((row_tile, cin), lambda i: (i, 0)),
            pl.BlockSpec((cin, cexp), lambda i: (0, 0)),
        ],
        out_specs=(
            pl.BlockSpec((row_tile, cexp), lambda i: (i, 0)),
            pl.BlockSpec((None, 2, cexp), lambda i: (i, 0, 0)),
        ),
        out_shape=(
            jax.ShapeDtypeStruct((m_rows, cexp), out_dtype),
            jax.ShapeDtypeStruct((n_tiles, 2, cexp), jnp.float32),
        ),
        compiler_params=_compiler_params(("parallel",)),
        cost_estimate=pl.CostEstimate(flops=flops, transcendentals=0,
                                      bytes_accessed=bytes_accessed),
    )(x2d, w1)


# --------------------------------------------------------------------------------------
# Kernel B: deferred BN1+SiLU on load, depthwise KxK conv (stride 1, SAME) as K*K shifted
# MACs.  H-tiled with an in-kernel halo: two extra pad-row BlockSpecs on the same tensor
# provide the neighbouring rows (masked to zero at image boundaries).  Emits raw conv
# output + per-tile centered BN2 stats.
# --------------------------------------------------------------------------------------
def _dw_kernel(y_ref, ytop_ref, ybot_ref, aff1_ref, wdw_ref, out_ref, st_ref, hp_ref,
               *, K, WL):
    TH, W, C = out_ref.shape
    pad = K // 2
    t = pl.program_id(1)
    nt = pl.num_programs(1)
    a1 = aff1_ref[0:1, :].reshape(1, 1, C)
    c1 = aff1_ref[1:2, :].reshape(1, 1, C)

    def bn1_silu(v):
        h = v.astype(jnp.float32) * a1 + c1                # deferred BN1 (folded affine)
        return h * jax.nn.sigmoid(h)                       # SiLU

    # Zero only the SAME-padding border columns actually read by the taps; the interior
    # and the halo rows are fully overwritten below (no full-scratch zero fill).
    zcol = jnp.zeros((TH + 2 * pad, pad, C), hp_ref.dtype)
    hp_ref[:, WL - pad:WL, :] = zcol
    hp_ref[:, WL + W:WL + W + pad, :] = zcol

    # Interior rows stored at a sublane-aligned W offset.
    hp_ref[pad:pad + TH, WL:WL + W, :] = bn1_silu(y_ref[...]).astype(hp_ref.dtype)
    # Halo rows from the neighbouring H tiles; zeroed at the top/bottom of the image.
    top = bn1_silu(ytop_ref[...]) * jnp.where(t == 0, 0.0, 1.0)
    bot = bn1_silu(ybot_ref[...]) * jnp.where(t == nt - 1, 0.0, 1.0)
    hp_ref[0:pad, WL:WL + W, :] = top.astype(hp_ref.dtype)
    hp_ref[pad + TH:2 * pad + TH, WL:WL + W, :] = bot.astype(hp_ref.dtype)

    acc = jnp.zeros((TH, W, C), jnp.float32)
    for di in range(K):                                    # K*K shifted MACs on the VPU
        for dj in range(K):
            w_tap = wdw_ref[di * K + dj:di * K + dj + 1, :].reshape(1, 1, C)
            tap = hp_ref[di:di + TH, WL - pad + dj:WL - pad + dj + W, :].astype(jnp.float32)
            acc = acc + tap * w_tap

    out_store = acc.astype(out_ref.dtype)
    out_ref[...] = out_store
    v = out_store.astype(jnp.float32).reshape(TH * W, C)   # stats from the stored values
    m = jnp.sum(v, axis=0, keepdims=True) * (1.0 / (TH * W))
    d = v - m
    st_ref[0:1, :] = m
    st_ref[1:2, :] = jnp.sum(d * d, axis=0, keepdims=True)


def dw_conv(y1_4d, aff1, w_dw, *, K, th, out_dtype):
    N, H, W, C = y1_4d.shape
    pad = K // 2
    nt = H // th
    R = th // pad                                          # halo block index units
    align = 8 if jnp.dtype(out_dtype).itemsize >= 4 else 16
    WL = max(align, ((pad + align - 1) // align) * align)  # aligned interior W offset
    act_bytes = jnp.dtype(y1_4d.dtype).itemsize
    flops = N * H * W * C * (2 * K * K + 12)
    bytes_accessed = N * H * W * C * (act_bytes + jnp.dtype(out_dtype).itemsize)
    max_halo_blk = H // pad - 1

    def main_map(n, t):
        return (n, t, 0, 0)

    def top_map(n, t):
        return (n, jnp.maximum(t * R - 1, 0), 0, 0)

    def bot_map(n, t):
        return (n, jnp.minimum((t + 1) * R, max_halo_blk), 0, 0)

    return pl.pallas_call(
        functools.partial(_dw_kernel, K=K, WL=WL),
        grid=(N, nt),
        in_specs=[
            pl.BlockSpec((None, th, W, C), main_map),
            pl.BlockSpec((None, pad, W, C), top_map),
            pl.BlockSpec((None, pad, W, C), bot_map),
            pl.BlockSpec((2, C), lambda n, t: (0, 0)),
            pl.BlockSpec((K * K, C), lambda n, t: (0, 0)),
        ],
        out_specs=(
            pl.BlockSpec((None, th, W, C), main_map),
            pl.BlockSpec((None, None, 2, C), lambda n, t: (n, t, 0, 0)),
        ),
        out_shape=(
            jax.ShapeDtypeStruct((N, H, W, C), out_dtype),
            jax.ShapeDtypeStruct((N, nt, 2, C), jnp.float32),
        ),
        scratch_shapes=[pltpu.VMEM((th + 2 * pad, WL + W + pad, C), jnp.dtype(out_dtype))],
        compiler_params=_compiler_params(("parallel", "parallel")),
        cost_estimate=pl.CostEstimate(flops=flops, transcendentals=N * H * W * C,
                                      bytes_accessed=bytes_accessed),
    )(y1_4d, y1_4d, y1_4d, aff1, w_dw)


# --------------------------------------------------------------------------------------
# Kernel C: squeeze-excite pooling — BN2+SiLU applied on the fly, H-tiled partial sums.
# Read-only over the big tensor; mean finished in XLA, gate multiply fused into kernel D.
# --------------------------------------------------------------------------------------
def _se_pool_kernel(x_ref, aff2_ref, out_ref):
    TH, W, C = x_ref.shape
    a2 = aff2_ref[0:1, :].reshape(1, 1, C)
    c2 = aff2_ref[1:2, :].reshape(1, 1, C)
    h = x_ref[...].astype(jnp.float32) * a2 + c2
    h = h * jax.nn.sigmoid(h)
    out_ref[...] = jnp.sum(h.reshape(TH * W, C), axis=0, keepdims=True)


def se_pool(acc2_4d, aff2, *, th):
    N, H, W, C = acc2_4d.shape
    nt = H // th
    sums = pl.pallas_call(
        _se_pool_kernel,
        grid=(N, nt),
        in_specs=[
            pl.BlockSpec((None, th, W, C), lambda n, t: (n, t, 0, 0)),
            pl.BlockSpec((2, C), lambda n, t: (0, 0)),
        ],
        out_specs=pl.BlockSpec((None, None, 1, C), lambda n, t: (n, t, 0, 0)),
        out_shape=jax.ShapeDtypeStruct((N, nt, 1, C), jnp.float32),
        compiler_params=_compiler_params(("parallel", "parallel")),
        cost_estimate=pl.CostEstimate(
            flops=N * H * W * C * 6, transcendentals=N * H * W * C,
            bytes_accessed=N * H * W * C * acc2_4d.dtype.itemsize),
    )(acc2_4d, aff2)
    return jnp.sum(sums[:, :, 0, :], axis=1) * (1.0 / (H * W))          # (N, C)


# --------------------------------------------------------------------------------------
# Kernel D: projection conv (1x1) with BN2+SiLU and the SE gate fused in front of the
# matmul; writes act_dtype output + per-tile BN3 stats (BN3 affine + skip done in XLA).
# --------------------------------------------------------------------------------------
def _pw3_kernel(h_ref, aff2_ref, s_ref, w_ref, y_ref, st_ref):
    a2 = aff2_ref[0:1, :]
    c2 = aff2_ref[1:2, :]
    h = h_ref[...].astype(jnp.float32) * a2 + c2            # BN2 (folded) + SiLU
    h = h * jax.nn.sigmoid(h)
    h = h * s_ref[...]                                       # SE gate (1, Cexp) broadcast
    y = jnp.dot(h.astype(w_ref.dtype), w_ref[...], preferred_element_type=jnp.float32)
    y_store = y.astype(y_ref.dtype)
    y_ref[...] = y_store
    v = y_store.astype(jnp.float32)                          # stats from the stored values
    m = jnp.sum(v, axis=0, keepdims=True) * (1.0 / v.shape[0])
    d = v - m
    st_ref[0:1, :] = m
    st_ref[1:2, :] = jnp.sum(d * d, axis=0, keepdims=True)


def pw_conv3(acc2_3d, aff2, gate, w3, *, row_tile, out_dtype):
    N, HW, C = acc2_3d.shape
    cout = w3.shape[1]
    n_tiles = HW // row_tile
    flops = 2 * N * HW * C * cout + 10 * N * HW * C
    bytes_accessed = (acc2_3d.size * jnp.dtype(acc2_3d.dtype).itemsize
                      + N * HW * cout * jnp.dtype(out_dtype).itemsize)
    # TODO(synk): for Cout < 128 pack several row tiles / pad Cout so the stored output slab
    # is lane-dense (avoids masked vst); kept channels-minor for module fidelity.
    return pl.pallas_call(
        _pw3_kernel,
        grid=(N, n_tiles),
        in_specs=[
            pl.BlockSpec((None, row_tile, C), lambda n, t: (n, t, 0)),
            pl.BlockSpec((2, C), lambda n, t: (0, 0)),
            pl.BlockSpec((None, 1, C), lambda n, t: (n, 0, 0)),
            pl.BlockSpec((C, cout), lambda n, t: (0, 0)),
        ],
        out_specs=(
            pl.BlockSpec((None, row_tile, cout), lambda n, t: (n, t, 0)),
            pl.BlockSpec((None, None, 2, cout), lambda n, t: (n, t, 0, 0)),
        ),
        out_shape=(
            jax.ShapeDtypeStruct((N, HW, cout), out_dtype),
            jax.ShapeDtypeStruct((N, n_tiles, 2, cout), jnp.float32),
        ),
        compiler_params=_compiler_params(("parallel", "parallel")),
        cost_estimate=pl.CostEstimate(flops=flops, transcendentals=N * HW * C,
                                      bytes_accessed=bytes_accessed),
    )(acc2_3d, aff2, gate, w3)


# --------------------------------------------------------------------------------------
# MBConv forward (NCHW in / NCHW out, like the PyTorch module)
# --------------------------------------------------------------------------------------
def mbconv_forward(x_nchw, p, *, expand, kernel=3, stride=1,
                   act_dtype=jnp.bfloat16, row_tile=None, h_tile=None):
    assert stride == 1             # TODO(synk): stride > 1 depthwise path not implemented
    assert kernel % 2 == 1 and kernel >= 3
    N, Cin, H, W = x_nchw.shape
    Cexp = Cin * expand
    Cout = p["w3"].shape[1]
    HW = H * W
    M = N * HW
    use_skip = (Cin == Cout) and stride == 1
    act_dtype = jnp.dtype(act_dtype)
    pad = kernel // 2

    # Single transpose; cast straight to act_dtype for Kernel A (no extra f32 HBM pass).
    x_nhwc = jnp.transpose(x_nchw, (0, 2, 3, 1))                          # NHWC
    x2d = x_nhwc.reshape(M, Cin).astype(act_dtype)

    tm_a = _pick_row_tile(M, row_tile)
    tm_d = _pick_row_tile(HW, row_tile)
    th = h_tile if h_tile is not None else _pick_h_tile(H, W, Cexp, pad, act_dtype.itemsize)
    assert H % th == 0 and th % pad == 0

    # Kernel A: 1x1 expansion conv (raw) + per-tile BN1 stats
    y1, st1 = pw_conv1(x2d, p["w1"].astype(act_dtype), row_tile=tm_a, out_dtype=act_dtype)
    mu1, var1 = _combine_stats(st1, tm_a)
    aff1 = _bn_affine(mu1, var1, p["g1"], p["b1"])                        # (2, Cexp)

    # Kernel B: deferred BN1+SiLU + H-tiled depthwise conv (raw) + per-tile BN2 stats
    acc2, st2 = dw_conv(y1.reshape(N, H, W, Cexp), aff1,
                        p["w_dw"].astype(jnp.float32), K=kernel, th=th, out_dtype=act_dtype)
    mu2, var2 = _combine_stats(st2.reshape(-1, 2, Cexp), th * W)
    aff2 = _bn_affine(mu2, var2, p["g2"], p["b2"])

    # Kernel C + tiny XLA MLP: squeeze-excite gate (BN2+SiLU applied on the fly)
    pooled = se_pool(acc2, aff2, th=th)                                   # (N, Cexp) f32
    gate = jax.nn.sigmoid(
        _silu(pooled @ p["se_w1"] + p["se_b1"]) @ p["se_w2"] + p["se_b2"])
    gate = gate.reshape(N, 1, Cexp).astype(jnp.float32)

    # Kernel D: BN2+SiLU+gate fused into 1x1 projection conv + per-tile BN3 stats
    y3, st3 = pw_conv3(acc2.reshape(N, HW, Cexp), aff2, gate,
                       p["w3"].astype(act_dtype), row_tile=tm_d, out_dtype=act_dtype)
    mu3, var3 = _combine_stats(st3.reshape(-1, 2, Cout), tm_d)

    # XLA epilogue on the small (Cout) tensor: BN3 affine (f32 math) + residual skip
    a3 = p["g3"].reshape(-1) * jax.lax.rsqrt(var3 + _EPS)
    c3 = p["b3"].reshape(-1) - mu3 * a3
    out = (y3.astype(jnp.float32) * a3 + c3).reshape(N, H, W, Cout)
    if use_skip:
        out = out + x_nhwc.astype(jnp.float32)
    return jnp.transpose(out, (0, 3, 1, 2))                               # NCHW


# --------------------------------------------------------------------------------------
# Pure-JAX reference (same math via XLA) for correctness check
# --------------------------------------------------------------------------------------
def mbconv_ref(x_nchw, p, *, expand, kernel=3):
    N, Cin, H, W = x_nchw.shape
    Cout = p["w3"].shape[1]
    x = jnp.transpose(x_nchw, (0, 2, 3, 1))

    def bn(y, g, b):
        axes = tuple(range(y.ndim - 1))
        mu = jnp.mean(y, axis=axes, keepdims=True)
        var = jnp.mean((y - mu) ** 2, axis=axes, keepdims=True)
        return (y - mu) / jnp.sqrt(var + _EPS) * g + b

    h = _silu(bn(jnp.einsum("nhwc,cd->nhwd", x, p["w1"]), p["g1"], p["b1"]))
    pad = kernel // 2
    hp = jnp.pad(h, ((0, 0), (pad, pad), (pad, pad), (0, 0)))
    acc = jnp.zeros_like(h)
    for di in range(kernel):
        for dj in range(kernel):
            acc = acc + hp[:, di:di + H, dj:dj + W, :] * p["w_dw"][di * kernel + dj]
    h = _silu(bn(acc, p["g2"], p["b2"]))
    m = jnp.mean(h, axis=(1, 2))
    s = _silu(m @ p["se_w1"] + p["se_b1"]) @ p["se_w2"] + p["se_b2"]
    h = h * jax.nn.sigmoid(s)[:, None, None, :]
    out = bn(jnp.einsum("nhwc,cd->nhwd", h, p["w3"]), p["g3"], p["b3"])
    if Cin == Cout:
        out = out + x
    return jnp.transpose(out, (0, 3, 1, 2))


if __name__ == "__main__":
    N, Cin, H, W = 2, 4, 16, 16
    expand, K, stride = 4, 3, 1
    Cout = 4                       # == Cin and stride == 1  =>  use_skip = True
    Cexp = Cin * expand
    Cr = Cexp // 4                 # SE reduction = 4

    key = jax.random.PRNGKey(0)
    ks = jax.random.split(key, 8)
    p = {
        # conv1: PyTorch (Cexp, Cin, 1, 1) -> stored transposed as (Cin, Cexp)
        "w1": 0.2 * jax.random.normal(ks[0], (Cin, Cexp), jnp.float32),
        "g1": jnp.ones((1, Cexp), jnp.float32),
        "b1": jnp.zeros((1, Cexp), jnp.float32),
        # conv2 depthwise: PyTorch (Cexp, 1, K, K) -> stored as (K*K, Cexp)
        "w_dw": 0.2 * jax.random.normal(ks[1], (K * K, Cexp), jnp.float32),
        "g2": jnp.ones((1, Cexp), jnp.float32),
        "b2": jnp.zeros((1, Cexp), jnp.float32),
        # SE linears (weights stored transposed, biases as (1, C))
        "se_w1": 0.2 * jax.random.normal(ks[2], (Cexp, Cr), jnp.float32),
        "se_b1": 0.1 * jax.random.normal(ks[3], (1, Cr), jnp.float32),
        "se_w2": 0.2 * jax.random.normal(ks[4], (Cr, Cexp), jnp.float32),
        "se_b2": 0.1 * jax.random.normal(ks[5], (1, Cexp), jnp.float32),
        # conv3: PyTorch (Cout, Cexp, 1, 1) -> stored transposed as (Cexp, Cout)
        "w3": 0.2 * jax.random.normal(ks[6], (Cexp, Cout), jnp.float32),
        "g3": jnp.ones((1, Cout), jnp.float32),
        "b3": jnp.zeros((1, Cout), jnp.float32),
    }
    x = jax.random.normal(ks[7], (N, Cin, H, W), jnp.float32)             # NCHW

    ref = mbconv_ref(x, p, expand=expand, kernel=K)

    # f32 activation-storage path with small explicit tiles: exercises multi-tile BN stat
    # combining and the H-tiled halo path exactly; must match the XLA reference tightly.
    fwd_f32 = jax.jit(functools.partial(mbconv_forward, expand=expand, kernel=K,
                                        stride=stride, act_dtype=jnp.float32,
                                        row_tile=128, h_tile=4))
    out_f32 = jax.block_until_ready(fwd_f32(x, p))
    assert out_f32.shape == (N, Cout, H, W)
    err_f32 = float(jnp.max(jnp.abs(out_f32 - ref)))
    assert err_f32 < 2e-3, f"f32 path max_err={err_f32}"

    # bf16 activation-storage path (default; halves HBM traffic / VMEM footprint), auto row
    # tiles + H tile of 8 (still multi-tile halo); tolerance sized for bf16 rounding noise.
    fwd_bf16 = jax.jit(functools.partial(mbconv_forward, expand=expand, kernel=K,
                                         stride=stride, act_dtype=jnp.bfloat16,
                                         h_tile=8))
    out_bf16 = jax.block_until_ready(fwd_bf16(x, p))
    assert out_bf16.shape == (N, Cout, H, W)
    err_bf16 = float(jnp.max(jnp.abs(out_bf16 - ref)))
    assert err_bf16 < 1.5e-1, f"bf16 path max_err={err_bf16}"

    print("KERNEL_OK")
</pallas_src>

<mosaic_0001>
module attributes {stable_mosaic.version = 11 : i64} {
  func.func @_pw1_kernel(%arg0: i32, %arg1: memref<128x4xf32, #tpu.memory_space<vmem>>, %arg2: memref<4x16xf32, #tpu.memory_space<vmem>>, %arg3: memref<128x16xf32, #tpu.memory_space<vmem>>, %arg4: memref<1x2x16xf32, #tpu.memory_space<vmem>>) attributes {dimension_semantics = [#tpu.dimension_semantics<parallel>], iteration_bounds = array<i64: 4>, scalar_prefetch = 0 : i64, scratch_operands = 0 : i64, tpu.core_type = #tpu.core_type<tc>, window_params = [{transform_indices = @transform_0, window_bounds = array<i64: 128, 4>}, {pipeline_mode = #tpu.pipeline_mode<synchronous>, transform_indices = @transform_1, window_bounds = array<i64: 4, 16>}, {transform_indices = @transform_2, window_bounds = array<i64: 128, 16>}, {transform_indices = @transform_3, window_bounds = array<i64: 1, 2, 16>}]} {
    %c0 = arith.constant 0 : index
    %c0_0 = arith.constant 0 : index
    %0 = vector.load %arg1[%c0, %c0_0] : memref<128x4xf32, #tpu.memory_space<vmem>>, vector<128x4xf32>
    %c0_1 = arith.constant 0 : index
    %c0_2 = arith.constant 0 : index
    %1 = vector.load %arg2[%c0_1, %c0_2] : memref<4x16xf32, #tpu.memory_space<vmem>>, vector<4x16xf32>
    %cst = arith.constant dense<0.000000e+00> : vector<128x16xf32>
    %2 = tpu.matmul %0, %1, %cst {dimension_numbers = #tpu.dot_dimension_numbers<[1], [0], [0], [1], [0, 0, 1, 1], [], []>} : vector<128x4xf32>, vector<4x16xf32>, vector<128x16xf32> -> vector<128x16xf32>
    %c0_3 = arith.constant 0 : index
    %c0_4 = arith.constant 0 : index
    %3 = vector.load %arg3[%c0_3, %c0_4] : memref<128x16xf32, #tpu.memory_space<vmem>>, vector<128x16xf32>
    tpu.vector_store %arg3[%c0_3, %c0_4], %2 {strides = array<i32>} : memref<128x16xf32, #tpu.memory_space<vmem>>, vector<128x16xf32>,
    %cst_5 = arith.constant dense<0.000000e+00> : vector<16xf32>
    %4 = vector.multi_reduction <add>, %2, %cst_5 [0] : vector<128x16xf32> to vector<16xf32>
    %5 = vector.shape_cast %4 : vector<16xf32> to vector<1x16xf32>
    %cst_6 = arith.constant 7.812500e-03 : f32
    %6 = vector.broadcast %cst_6 : f32 to vector<1x16xf32>
    %7 = arith.mulf %5, %6 : vector<1x16xf32>
    %8 = vector.broadcast %7 : vector<1x16xf32> to vector<128x16xf32>
    %9 = arith.subf %2, %8 : vector<128x16xf32>
    %c0_7 = arith.constant 0 : index
    %c0_8 = arith.constant 0 : index
    %c0_9 = arith.constant 0 : index
    %10 = vector.load %arg4[%c0_7, %c0_8, %c0_9] : memref<1x2x16xf32, #tpu.memory_space<vmem>>, vector<1x1x16xf32>
    %11 = vector.shape_cast %10 : vector<1x1x16xf32> to vector<1x16xf32>
    %12 = vector.shape_cast %7 : vector<1x16xf32> to vector<1x1x16xf32>
    tpu.vector_store %arg4[%c0_7, %c0_8, %c0_9], %12 {strides = array<i32>} : memref<1x2x16xf32, #tpu.memory_space<vmem>>, vector<1x1x16xf32>,
    %13 = arith.mulf %9, %9 : vector<128x16xf32>
    %cst_10 = arith.constant dense<0.000000e+00> : vector<16xf32>
    %14 = vector.multi_reduction <add>, %13, %cst_10 [0] : vector<128x16xf32> to vector<16xf32>
    %15 = vector.shape_cast %14 : vector<16xf32> to vector<1x16xf32>
    %c0_11 = arith.constant 0 : index
    %c1 = arith.constant 1 : index
    %c0_12 = arith.constant 0 : index
    %16 = vector.load %arg4[%c0_11, %c1, %c0_12] : memref<1x2x16xf32, #tpu.memory_space<vmem>>, vector<1x1x16xf32>
    %17 = vector.shape_cast %16 : vector<1x1x16xf32> to vector<1x16xf32>
    %18 = vector.shape_cast %15 : vector<1x16xf32> to vector<1x1x16xf32>
    tpu.vector_store %arg4[%c0_11, %c1, %c0_12], %18 {strides = array<i32>} : memref<1x2x16xf32, #tpu.memory_space<vmem>>, vector<1x1x16xf32>,
    return
  }
  func.func @transform_0(%arg0: i32) -> (i32, i32) {
    %c0_i32 = arith.constant 0 : i32
    %c0_i32_0 = arith.constant 0 : i32
    return %arg0, %c0_i32 : i32, i32
  }
  func.func @transform_1(%arg0: i32) -> (i32, i32) {
    %c0_i32 = arith.constant 0 : i32
    %c0_i32_0 = arith.constant 0 : i32
    %c0_i32_1 = arith.constant 0 : i32
    return %c0_i32, %c0_i32_0 : i32, i32
  }
  func.func @transform_2(%arg0: i32) -> (i32, i32) {
    %c0_i32 = arith.constant 0 : i32
    %c0_i32_0 = arith.constant 0 : i32
    return %arg0, %c0_i32 : i32, i32
  }
  func.func @transform_3(%arg0: i32) -> (i32, i32, i32) {
    %c0_i32 = arith.constant 0 : i32
    %c0_i32_0 = arith.constant 0 : i32
    %c0_i32_1 = arith.constant 0 : i32
    return %arg0, %c0_i32, %c0_i32_0 : i32, i32, i32
  }
}

module attributes {stable_mosaic.version = 11 : i64} {
  func.func @_dw_kernel(%arg0: i32, %arg1: i32, %arg2: memref<1x4x16x16xf32, #tpu.memory_space<vmem>>, %arg3: memref<1x1x16x16xf32, #tpu.memory_space<vmem>>, %arg4: memref<1x1x16x16xf32, #tpu.memory_space<vmem>>, %arg5: memref<2x16xf32, #tpu.memory_space<vmem>>, %arg6: memref<9x16xf32, #tpu.memory_space<vmem>>, %arg7: memref<1x4x16x16xf32, #tpu.memory_space<vmem>>, %arg8: memref<1x1x2x16xf32, #tpu.memory_space<vmem>>, %arg9: memref<6x25x16xf32, #tpu.memory_space<vmem>>) attributes {dimension_semantics = [#tpu.dimension_semantics<parallel>, #tpu.dimension_semantics<parallel>], iteration_bounds = array<i64: 2, 4>, scalar_prefetch = 0 : i64, scratch_operands = 1 : i64, tpu.core_type = #tpu.core_type<tc>, window_params = [{transform_indices = @transform_0, window_bounds = array<i64: 1, 4, 16, 16>}, {transform_indices = @transform_1, window_bounds = array<i64: 1, 1, 16, 16>}, {transform_indices = @transform_2, window_bounds = array<i64: 1, 1, 16, 16>}, {pipeline_mode = #tpu.pipeline_mode<synchronous>, transform_indices = @transform_3, window_bounds = array<i64: 2, 16>}, {pipeline_mode = #tpu.pipeline_mode<synchronous>, transform_indices = @transform_4, window_bounds = array<i64: 9, 16>}, {transform_indices = @transform_5, window_bounds = array<i64: 1, 4, 16, 16>}, {transform_indices = @transform_6, window_bounds = array<i64: 1, 1, 2, 16>}]} {
    %c0 = arith.constant 0 : index
    %c0_0 = arith.constant 0 : index
    %0 = vector.load %arg5[%c0, %c0_0] : memref<2x16xf32, #tpu.memory_space<vmem>>, vector<1x16xf32>
    %1 = vector.shape_cast %0 : vector<1x16xf32> to vector<1x1x16xf32>
    %c1 = arith.constant 1 : index
    %c0_1 = arith.constant 0 : index
    %2 = vector.load %arg5[%c1, %c0_1] : memref<2x16xf32, #tpu.memory_space<vmem>>, vector<1x16xf32>
    %3 = vector.shape_cast %2 : vector<1x16xf32> to vector<1x1x16xf32>
    %cst = arith.constant 0.000000e+00 : f32
    %4 = vector.broadcast %cst : f32 to vector<6x1x16xf32>
    %c0_2 = arith.constant 0 : index
    %c7 = arith.constant 7 : index
    %c0_3 = arith.constant 0 : index
    %5 = vector.load %arg9[%c0_2, %c7, %c0_3] : memref<6x25x16xf32, #tpu.memory_space<vmem>>, vector<6x1x16xf32>
    tpu.vector_store %arg9[%c0_2, %c7, %c0_3], %4 {strides = array<i32>} : memref<6x25x16xf32, #tpu.memory_space<vmem>>, vector<6x1x16xf32>,
    %c0_4 = arith.constant 0 : index
    %c24 = arith.constant 24 : index
    %c0_5 = arith.constant 0 : index
    %6 = vector.load %arg9[%c0_4, %c24, %c0_5] : memref<6x25x16xf32, #tpu.memory_space<vmem>>, vector<6x1x16xf32>
    tpu.vector_store %arg9[%c0_4, %c24, %c0_5], %4 {strides = array<i32>} : memref<6x25x16xf32, #tpu.memory_space<vmem>>, vector<6x1x16xf32>,
    %c0_6 = arith.constant 0 : index
    %c0_7 = arith.constant 0 : index
    %c0_8 = arith.constant 0 : index
    %c0_9 = arith.constant 0 : index
    %7 = vector.load %arg2[%c0_6, %c0_7, %c0_8, %c0_9] : memref<1x4x16x16xf32, #tpu.memory_space<vmem>>, vector<1x4x16x16xf32>
    %8 = vector.shape_cast %7 : vector<1x4x16x16xf32> to vector<4x16x16xf32>
    %9 = vector.broadcast %1 : vector<1x1x16xf32> to vector<4x16x16xf32>
    %10 = arith.mulf %8, %9 : vector<4x16x16xf32>
    %11 = vector.broadcast %3 : vector<1x1x16xf32> to vector<4x16x16xf32>
    %12 = arith.addf %10, %11 : vector<4x16x16xf32>
    %13 = arith.negf %12 : vector<4x16x16xf32>
    %14 = math.exp %13 : vector<4x16x16xf32>
    %cst_10 = arith.constant 1.000000e+00 : f32
    %15 = vector.broadcast %cst_10 : f32 to vector<4x16x16xf32>
    %16 = arith.addf %15, %14 : vector<4x16x16xf32>
    %17 = arith.divf %15, %16 : vector<4x16x16xf32>
    %18 = arith.mulf %12, %17 : vector<4x16x16xf32>
    %c1_11 = arith.constant 1 : index
    %c8 = arith.constant 8 : index
    %c0_12 = arith.constant 0 : index
    %19 = vector.load %arg9[%c1_11, %c8, %c0_12] : memref<6x25x16xf32, #tpu.memory_space<vmem>>, vector<4x16x16xf32>
    tpu.vector_store %arg9[%c1_11, %c8, %c0_12], %18 {strides = array<i32>} : memref<6x25x16xf32, #tpu.memory_space<vmem>>, vector<4x16x16xf32>,
    %c0_13 = arith.constant 0 : index
    %c0_14 = arith.constant 0 : index
    %c0_15 = arith.constant 0 : index
    %c0_16 = arith.constant 0 : index
    %20 = vector.load %arg3[%c0_13, %c0_14, %c0_15, %c0_16] : memref<1x1x16x16xf32, #tpu.memory_space<vmem>>, vector<1x1x16x16xf32>
    %21 = vector.shape_cast %20 : vector<1x1x16x16xf32> to vector<1x16x16xf32>
    %22 = vector.broadcast %1 : vector<1x1x16xf32> to vector<1x16x16xf32>
    %23 = arith.mulf %21, %22 : vector<1x16x16xf32>
    %24 = vector.broadcast %3 : vector<1x1x16xf32> to vector<1x16x16xf32>
    %25 = arith.addf %23, %24 : vector<1x16x16xf32>
    %26 = arith.negf %25 : vector<1x16x16xf32>
    %27 = math.exp %26 : vector<1x16x16xf32>
    %cst_17 = arith.constant 1.000000e+00 : f32
    %28 = vector.broadcast %cst_17 : f32 to vector<1x16x16xf32>
    %29 = arith.addf %28, %27 : vector<1x16x16xf32>
    %30 = arith.divf %28, %29 : vector<1x16x16xf32>
    %31 = arith.mulf %25, %30 : vector<1x16x16xf32>
    %c0_i32 = arith.constant 0 : i32
    %32 = arith.cmpi eq, %arg1, %c0_i32 : i32
    %cst_18 = arith.constant 0.000000e+00 : f32
    %cst_19 = arith.constant 1.000000e+00 : f32
    %33 = arith.select %32, %cst_18, %cst_19 : f32
    %34 = vector.broadcast %33 : f32 to vector<1x16x16xf32>
    %35 = arith.mulf %31, %34 : vector<1x16x16xf32>
    %c0_20 = arith.constant 0 : index
    %c0_21 = arith.constant 0 : index
    %c0_22 = arith.constant 0 : index
    %c0_23 = arith.constant 0 : index
    %36 = vector.load %arg4[%c0_20, %c0_21, %c0_22, %c0_23] : memref<1x1x16x16xf32, #tpu.memory_space<vmem>>, vector<1x1x16x16xf32>
    %37 = vector.shape_cast %36 : vector<1x1x16x16xf32> to vector<1x16x16xf32>
    %38 = vector.broadcast %1 : vector<1x1x16xf32> to vector<1x16x16xf32>
    %39 = arith.mulf %37, %38 : vector<1x16x16xf32>
    %40 = vector.broadcast %3 : vector<1x1x16xf32> to vector<1x16x16xf32>
    %41 = arith.addf %39, %40 : vector<1x16x16xf32>
    %42 = arith.negf %41 : vector<1x16x16xf32>
    %43 = math.exp %42 : vector<1x16x16xf32>
    %cst_24 = arith.constant 1.000000e+00 : f32
    %44 = vector.broadcast %cst_24 : f32 to vector<1x16x16xf32>
    %45 = arith.addf %44, %43 : vector<1x16x16xf32>
    %46 = arith.divf %44, %45 : vector<1x16x16xf32>
    %47 = arith.mulf %41, %46 : vector<1x16x16xf32>
    %c3_i32 = arith.constant 3 : i32
    %48 = arith.cmpi eq, %arg1, %c3_i32 : i32
    %cst_25 = arith.constant 0.000000e+00 : f32
    %cst_26 = arith.constant 1.000000e+00 : f32
    %49 = arith.select %48, %cst_25, %cst_26 : f32
    %50 = vector.broadcast %49 : f32 to vector<1x16x16xf32>
    %51 = arith.mulf %47, %50 : vector<1x16x16xf32>
    %c0_27 = arith.constant 0 : index
    %c8_28 = arith.constant 8 : index
    %c0_29 = arith.constant 0 : index
    %52 = vector.load %arg9[%c0_27, %c8_28, %c0_29] : memref<6x25x16xf32, #tpu.memory_space<vmem>>, vector<1x16x16xf32>
    tpu.vector_store %arg9[%c0_27, %c8_28, %c0_29], %35 {strides = array<i32>} : memref<6x25x16xf32, #tpu.memory_space<vmem>>, vector<1x16x16xf32>,
    %c5 = arith.constant 5 : index
    %c8_30 = arith.constant 8 : index
    %c0_31 = arith.constant 0 : index
    %53 = vector.load %arg9[%c5, %c8_30, %c0_31] : memref<6x25x16xf32, #tpu.memory_space<vmem>>, vector<1x16x16xf32>
    tpu.vector_store %arg9[%c5, %c8_30, %c0_31], %51 {strides = array<i32>} : memref<6x25x16xf32, #tpu.memory_space<vmem>>, vector<1x16x16xf32>,
    %cst_32 = arith.constant 0.000000e+00 : f32
    %54 = vector.broadcast %cst_32 : f32 to vector<4x16x16xf32>
    %c0_33 = arith.constant 0 : index
    %c0_34 = arith.constant 0 : index
    %55 = vector.load %arg6[%c0_33, %c0_34] : memref<9x16xf32, #tpu.memory_space<vmem>>, vector<1x16xf32>
    %56 = vector.shape_cast %55 : vector<1x16xf32> to vector<1x1x16xf32>
    %c0_35 = arith.constant 0 : index
    %c7_36 = arith.constant 7 : index
    %c0_37 = arith.constant 0 : index
    %57 = vector.load %arg9[%c0_35, %c7_36, %c0_37] : memref<6x25x16xf32, #tpu.memory_space<vmem>>, vector<4x16x16xf32>
    %58 = vector.broadcast %56 : vector<1x1x16xf32> to vector<4x16x16xf32>
    %59 = arith.mulf %57, %58 : vector<4x16x16xf32>
    %60 = arith.addf %54, %59 : vector<4x16x16xf32>
    %c1_38 = arith.constant 1 : index
    %c0_39 = arith.constant 0 : index
    %61 = vector.load %arg6[%c1_38, %c0_39] : memref<9x16xf32, #tpu.memory_space<vmem>>, vector<1x16xf32>
    %62 = vector.shape_cast %61 : vector<1x16xf32> to vector<1x1x16xf32>
    %c0_40 = arith.constant 0 : index
    %c8_41 = arith.constant 8 : index
    %c0_42 = arith.constant 0 : index
    %63 = vector.load %arg9[%c0_40, %c8_41, %c0_42] : memref<6x25x16xf32, #tpu.memory_space<vmem>>, vector<4x16x16xf32>
    %64 = vector.broadcast %62 : vector<1x1x16xf32> to vector<4x16x16xf32>
    %65 = arith.mulf %63, %64 : vector<4x16x16xf32>
    %66 = arith.addf %60, %65 : vector<4x16x16xf32>
    %c2 = arith.constant 2 : index
    %c0_43 = arith.constant 0 : index
    %67 = vector.load %arg6[%c2, %c0_43] : memref<9x16xf32, #tpu.memory_space<vmem>>, vector<1x16xf32>
    %68 = vector.shape_cast %67 : vector<1x16xf32> to vector<1x1x16xf32>
    %c0_44 = arith.constant 0 : index
    %c9 = arith.constant 9 : index
    %c0_45 = arith.constant 0 : index
    %69 = vector.load %arg9[%c0_44, %c9, %c0_45] : memref<6x25x16xf32, #tpu.memory_space<vmem>>, vector<4x16x16xf32>
    %70 = vector.broadcast %68 : vector<1x1x16xf32> to vector<4x16x16xf32>
    %71 = arith.mulf %69, %70 : vector<4x16x16xf32>
    %72 = arith.addf %66, %71 : vector<4x16x16xf32>
    %c3 = arith.constant 3 : index
    %c0_46 = arith.constant 0 : index
    %73 = vector.load %arg6[%c3, %c0_46] : memref<9x16xf32, #tpu.memory_space<vmem>>, vector<1x16xf32>
    %74 = vector.shape_cast %73 : vector<1x16xf32> to vector<1x1x16xf32>
    %c1_47 = arith.constant 1 : index
    %c7_48 = arith.constant 7 : index
    %c0_49 = arith.constant 0 : index
    %75 = vector.load %arg9[%c1_47, %c7_48, %c0_49] : memref<6x25x16xf32, #tpu.memory_space<vmem>>, vector<4x16x16xf32>
    %76 = vector.broadcast %74 : vector<1x1x16xf32> to vector<4x16x16xf32>
    %77 = arith.mulf %75, %76 : vector<4x16x16xf32>
    %78 = arith.addf %72, %77 : vector<4x16x16xf32>
    %c4 = arith.constant 4 : index
    %c0_50 = arith.constant 0 : index
    %79 = vector.load %arg6[%c4, %c0_50] : memref<9x16xf32, #tpu.memory_space<vmem>>, vector<1x16xf32>
    %80 = vector.shape_cast %79 : vector<1x16xf32> to vector<1x1x16xf32>
    %c1_51 = arith.constant 1 : index
    %c8_52 = arith.constant 8 : index
    %c0_53 = arith.constant 0 : index
    %81 = vector.load %arg9[%c1_51, %c8_52, %c0_53] : memref<6x25x16xf32, #tpu.memory_space<vmem>>, vector<4x16x16xf32>
    %82 = vector.broadcast %80 : vector<1x1x16xf32> to vector<4x16x16xf32>
    %83 = arith.mulf %81, %82 : vector<4x16x16xf32>
    %84 = arith.addf %78, %83 : vector<4x16x16xf32>
    %c5_54 = arith.constant 5 : index
    %c0_55 = arith.constant 0 : index
    %85 = vector.load %arg6[%c5_54, %c0_55] : memref<9x16xf32, #tpu.memory_space<vmem>>, vector<1x16xf32>
    %86 = vector.shape_cast %85 : vector<1x16xf32> to vector<1x1x16xf32>
    %c1_56 = arith.constant 1 : index
    %c9_57 = arith.constant 9 : index
    %c0_58 = arith.constant 0 : index
    %87 = vector.load %arg9[%c1_56, %c9_57, %c0_58] : memref<6x25x16xf32, #tpu.memory_space<vmem>>, vector<4x16x16xf32>
    %88 = vector.broadcast %86 : vector<1x1x16xf32> to vector<4x16x16xf32>
    %89 = arith.mulf %87, %88 : vector<4x16x16xf32>
    %90 = arith.addf %84, %89 : vector<4x16x16xf32>
    %c6 = arith.constant 6 : index
    %c0_59 = arith.constant 0 : index
    %91 = vector.load %arg6[%c6, %c0_59] : memref<9x16xf32, #tpu.memory_space<vmem>>, vector<1x16xf32>
    %92 = vector.shape_cast %91 : vector<1x16xf32> to vector<1x1x16xf32>
    %c2_60 = arith.constant 2 : index
    %c7_61 = arith.constant 7 : index
    %c0_62 = arith.constant 0 : index
    %93 = vector.load %arg9[%c2_60, %c7_61, %c0_62] : memref<6x25x16xf32, #tpu.memory_space<vmem>>, vector<4x16x16xf32>
    %94 = vector.broadcast %92 : vector<1x1x16xf32> to vector<4x16x16xf32>
    %95 = arith.mulf %93, %94 : vector<4x16x16xf32>
    %96 = arith.addf %90, %95 : vector<4x16x16xf32>
    %c7_63 = arith.constant 7 : index
    %c0_64 = arith.constant 0 : index
    %97 = vector.load %arg6[%c7_63, %c0_64] : memref<9x16xf32, #tpu.memory_space<vmem>>, vector<1x16xf32>
    %98 = vector.shape_cast %97 : vector<1x16xf32> to vector<1x1x16xf32>
    %c2_65 = arith.constant 2 : index
    %c8_66 = arith.constant 8 : index
    %c0_67 = arith.constant 0 : index
    %99 = vector.load %arg9[%c2_65, %c8_66, %c0_67] : memref<6x25x16xf32, #tpu.memory_space<vmem>>, vector<4x16x16xf32>
    %100 = vector.broadcast %98 : vector<1x1x16xf32> to vector<4x16x16xf32>
    %101 = arith.mulf %99, %100 : vector<4x16x16xf32>
    %102 = arith.addf %96, %101 : vector<4x16x16xf32>
    %c8_68 = arith.constant 8 : index
    %c0_69 = arith.constant 0 : index
    %103 = vector.load %arg6[%c8_68, %c0_69] : memref<9x16xf32, #tpu.memory_space<vmem>>, vector<1x16xf32>
    %104 = vector.shape_cast %103 : vector<1x16xf32> to vector<1x1x16xf32>
    %c2_70 = arith.constant 2 : index
    %c9_71 = arith.constant 9 : index
    %c0_72 = arith.constant 0 : index
    %105 = vector.load %arg9[%c2_70, %c9_71, %c0_72] : memref<6x25x16xf32, #tpu.memory_space<vmem>>, vector<4x16x16xf32>
    %106 = vector.broadcast %104 : vector<1x1x16xf32> to vector<4x16x16xf32>
    %107 = arith.mulf %105, %106 : vector<4x16x16xf32>
    %108 = arith.addf %102, %107 : vector<4x16x16xf32>
    %c0_73 = arith.constant 0 : index
    %c0_74 = arith.constant 0 : index
    %c0_75 = arith.constant 0 : index
    %c0_76 = arith.constant 0 : index
    %109 = vector.load %arg7[%c0_73, %c0_74, %c0_75, %c0_76] : memref<1x4x16x16xf32, #tpu.memory_space<vmem>>, vector<1x4x16x16xf32>
    %110 = vector.shape_cast %109 : vector<1x4x16x16xf32> to vector<4x16x16xf32>
    %111 = vector.shape_cast %108 : vector<4x16x16xf32> to vector<1x4x16x16xf32>
    tpu.vector_store %arg7[%c0_73, %c0_74, %c0_75, %c0_76], %111 {strides = array<i32>} : memref<1x4x16x16xf32, #tpu.memory_space<vmem>>, vector<1x4x16x16xf32>,
    %112 = vector.shape_cast %108 : vector<4x16x16xf32> to vector<64x16xf32>
    %cst_77 = arith.constant dense<0.000000e+00> : vector<16xf32>
    %113 = vector.multi_reduction <add>, %112, %cst_77 [0] : vector<64x16xf32> to vector<16xf32>
    %114 = vector.shape_cast %113 : vector<16xf32> to vector<1x16xf32>
    %cst_78 = arith.constant 1.562500e-02 : f32
    %115 = vector.broadcast %cst_78 : f32 to vector<1x16xf32>
    %116 = arith.mulf %114, %115 : vector<1x16xf32>
    %117 = vector.broadcast %116 : vector<1x16xf32> to vector<64x16xf32>
    %118 = arith.subf %112, %117 : vector<64x16xf32>
    %c0_79 = arith.constant 0 : index
    %c0_80 = arith.constant 0 : index
    %c0_81 = arith.constant 0 : index
    %c0_82 = arith.constant 0 : index
    %119 = vector.load %arg8[%c0_79, %c0_80, %c0_81, %c0_82] : memref<1x1x2x16xf32, #tpu.memory_space<vmem>>, vector<1x1x1x16xf32>
    %120 = vector.shape_cast %119 : vector<1x1x1x16xf32> to vector<1x16xf32>
    %121 = vector.shape_cast %116 : vector<1x16xf32> to vector<1x1x1x16xf32>
    tpu.vector_store %arg8[%c0_79, %c0_80, %c0_81, %c0_82], %121 {strides = array<i32>} : memref<1x1x2x16xf32, #tpu.memory_space<vmem>>, vector<1x1x1x16xf32>,
    %122 = arith.mulf %118, %118 : vector<64x16xf32>
    %cst_83 = arith.constant dense<0.000000e+00> : vector<16xf32>
    %123 = vector.multi_reduction <add>, %122, %cst_83 [0] : vector<64x16xf32> to vector<16xf32>
    %124 = vector.shape_cast %123 : vector<16xf32> to vector<1x16xf32>
    %c0_84 = arith.constant 0 : index
    %c0_85 = arith.constant 0 : index
    %c1_86 = arith.constant 1 : index
    %c0_87 = arith.constant 0 : index
    %125 = vector.load %arg8[%c0_84, %c0_85, %c1_86, %c0_87] : memref<1x1x2x16xf32, #tpu.memory_space<vmem>>, vector<1x1x1x16xf32>
    %126 = vector.shape_cast %125 : vector<1x1x1x16xf32> to vector<1x16xf32>
    %127 = vector.shape_cast %124 : vector<1x16xf32> to vector<1x1x1x16xf32>
    tpu.vector_store %arg8[%c0_84, %c0_85, %c1_86, %c0_87], %127 {strides = array<i32>} : memref<1x1x2x16xf32, #tpu.memory_space<vmem>>, vector<1x1x1x16xf32>,
    return
  }
  func.func @transform_0(%arg0: i32, %arg1: i32) -> (i32, i32, i32, i32) {
    %c0_i32 = arith.constant 0 : i32
    %c0_i32_0 = arith.constant 0 : i32
    %c0_i32_1 = arith.constant 0 : i32
    return %arg0, %arg1, %c0_i32, %c0_i32_0 : i32, i32, i32, i32
  }
  func.func @transform_1(%arg0: i32, %arg1: i32) -> (i32, i32, i32, i32) {
    %c4_i32 = arith.constant 4 : i32
    %0 = arith.muli %arg1, %c4_i32 : i32
    %c1_i32 = arith.constant 1 : i32
    %1 = arith.subi %0, %c1_i32 : i32
    %c0_i32 = arith.constant 0 : i32
    %2 = arith.maxsi %1, %c0_i32 : i32
    %c0_i32_0 = arith.constant 0 : i32
    %c0_i32_1 = arith.constant 0 : i32
    %c0_i32_2 = arith.constant 0 : i32
    return %arg0, %2, %c0_i32_0, %c0_i32_1 : i32, i32, i32, i32
  }
  func.func @transform_2(%arg0: i32, %arg1: i32) -> (i32, i32, i32, i32) {
    %c1_i32 = arith.constant 1 : i32
    %0 = arith.addi %arg1, %c1_i32 : i32
    %c4_i32 = arith.constant 4 : i32
    %1 = arith.muli %0, %c4_i32 : i32
    %c15_i32 = arith.constant 15 : i32
    %2 = arith.minsi %1, %c15_i32 : i32
    %c0_i32 = arith.constant 0 : i32
    %c0_i32_0 = arith.constant 0 : i32
    %c0_i32_1 = arith.constant 0 : i32
    return %arg0, %2, %c0_i32, %c0_i32_0 : i32, i32, i32, i32
  }
  func.func @transform_3(%arg0: i32, %arg1: i32) -> (i32, i32) {
    %c0_i32 = arith.constant 0 : i32
    %c0_i32_0 = arith.constant 0 : i32
    %c0_i32_1 = arith.constant 0 : i32
    return %c0_i32, %c0_i32_0 : i32, i32
  }
  func.func @transform_4(%arg0: i32, %arg1: i32) -> (i32, i32) {
    %c0_i32 = arith.constant 0 : i32
    %c0_i32_0 = arith.constant 0 : i32
    %c0_i32_1 = arith.constant 0 : i32
    return %c0_i32, %c0_i32_0 : i32, i32
  }
  func.func @transform_5(%arg0: i32, %arg1: i32) -> (i32, i32, i32, i32) {
    %c0_i32 = arith.constant 0 : i32
    %c0_i32_0 = arith.constant 0 : i32
    %c0_i32_1 = arith.constant 0 : i32
    return %arg0, %arg1, %c0_i32, %c0_i32_0 : i32, i32, i32, i32
  }
  func.func @transform_6(%arg0: i32, %arg1: i32) -> (i32, i32, i32, i32) {
    %c0_i32 = arith.constant 0 : i32
    %c0_i32_0 = arith.constant 0 : i32
    %c0_i32_1 = arith.constant 0 : i32
    return %arg0, %arg1, %c0_i32, %c0_i32_0 : i32, i32, i32, i32
  }
}

module attributes {stable_mosaic.version = 11 : i64} {
  func.func @_se_pool_kernel(%arg0: i32, %arg1: i32, %arg2: memref<1x4x16x16xf32, #tpu.memory_space<vmem>>, %arg3: memref<2x16xf32, #tpu.memory_space<vmem>>, %arg4: memref<1x1x1x16xf32, #tpu.memory_space<vmem>>) attributes {dimension_semantics = [#tpu.dimension_semantics<parallel>, #tpu.dimension_semantics<parallel>], iteration_bounds = array<i64: 2, 4>, scalar_prefetch = 0 : i64, scratch_operands = 0 : i64, tpu.core_type = #tpu.core_type<tc>, window_params = [{transform_indices = @transform_0, window_bounds = array<i64: 1, 4, 16, 16>}, {pipeline_mode = #tpu.pipeline_mode<synchronous>, transform_indices = @transform_1, window_bounds = array<i64: 2, 16>}, {transform_indices = @transform_2, window_bounds = array<i64: 1, 1, 1, 16>}]} {
    %c0 = arith.constant 0 : index
    %c0_0 = arith.constant 0 : index
    %0 = vector.load %arg3[%c0, %c0_0] : memref<2x16xf32, #tpu.memory_space<vmem>>, vector<1x16xf32>
    %1 = vector.shape_cast %0 : vector<1x16xf32> to vector<1x1x16xf32>
    %c1 = arith.constant 1 : index
    %c0_1 = arith.constant 0 : index
    %2 = vector.load %arg3[%c1, %c0_1] : memref<2x16xf32, #tpu.memory_space<vmem>>, vector<1x16xf32>
    %3 = vector.shape_cast %2 : vector<1x16xf32> to vector<1x1x16xf32>
    %c0_2 = arith.constant 0 : index
    %c0_3 = arith.constant 0 : index
    %c0_4 = arith.constant 0 : index
    %c0_5 = arith.constant 0 : index
    %4 = vector.load %arg2[%c0_2, %c0_3, %c0_4, %c0_5] : memref<1x4x16x16xf32, #tpu.memory_space<vmem>>, vector<1x4x16x16xf32>
    %5 = vector.shape_cast %4 : vector<1x4x16x16xf32> to vector<4x16x16xf32>
    %6 = vector.broadcast %1 : vector<1x1x16xf32> to vector<4x16x16xf32>
    %7 = arith.mulf %5, %6 : vector<4x16x16xf32>
    %8 = vector.broadcast %3 : vector<1x1x16xf32> to vector<4x16x16xf32>
    %9 = arith.addf %7, %8 : vector<4x16x16xf32>
    %10 = arith.negf %9 : vector<4x16x16xf32>
    %11 = math.exp %10 : vector<4x16x16xf32>
    %cst = arith.constant 1.000000e+00 : f32
    %12 = vector.broadcast %cst : f32 to vector<4x16x16xf32>
    %13 = arith.addf %12, %11 : vector<4x16x16xf32>
    %14 = arith.divf %12, %13 : vector<4x16x16xf32>
    %15 = arith.mulf %9, %14 : vector<4x16x16xf32>
    %16 = vector.shape_cast %15 : vector<4x16x16xf32> to vector<64x16xf32>
    %cst_6 = arith.constant dense<0.000000e+00> : vector<16xf32>
    %17 = vector.multi_reduction <add>, %16, %cst_6 [0] : vector<64x16xf32> to vector<16xf32>
    %18 = vector.shape_cast %17 : vector<16xf32> to vector<1x16xf32>
    %c0_7 = arith.constant 0 : index
    %c0_8 = arith.constant 0 : index
    %c0_9 = arith.constant 0 : index
    %c0_10 = arith.constant 0 : index
    %19 = vector.load %arg4[%c0_7, %c0_8, %c0_9, %c0_10] : memref<1x1x1x16xf32, #tpu.memory_space<vmem>>, vector<1x1x1x16xf32>
    %20 = vector.shape_cast %19 : vector<1x1x1x16xf32> to vector<1x16xf32>
    %21 = vector.shape_cast %18 : vector<1x16xf32> to vector<1x1x1x16xf32>
    tpu.vector_store %arg4[%c0_7, %c0_8, %c0_9, %c0_10], %21 {strides = array<i32>} : memref<1x1x1x16xf32, #tpu.memory_space<vmem>>, vector<1x1x1x16xf32>,
    return
  }
  func.func @transform_0(%arg0: i32, %arg1: i32) -> (i32, i32, i32, i32) {
    %c0_i32 = arith.constant 0 : i32
    %c0_i32_0 = arith.constant 0 : i32
    %c0_i32_1 = arith.constant 0 : i32
    return %arg0, %arg1, %c0_i32, %c0_i32_0 : i32, i32, i32, i32
  }
  func.func @transform_1(%arg0: i32, %arg1: i32) -> (i32, i32) {
    %c0_i32 = arith.constant 0 : i32
    %c0_i32_0 = arith.constant 0 : i32
    %c0_i32_1 = arith.constant 0 : i32
    return %c0_i32, %c0_i32_0 : i32, i32
  }
  func.func @transform_2(%arg0: i32, %arg1: i32) -> (i32, i32, i32, i32) {
    %c0_i32 = arith.constant 0 : i32
    %c0_i32_0 = arith.constant 0 : i32
    %c0_i32_1 = arith.constant 0 : i32
    return %arg0, %arg1, %c0_i32, %c0_i32_0 : i32, i32, i32, i32
  }
}

module attributes {stable_mosaic.version = 11 : i64} {
  func.func @_pw3_kernel(%arg0: i32, %arg1: i32, %arg2: memref<1x128x16xf32, #tpu.memory_space<vmem>>, %arg3: memref<2x16xf32, #tpu.memory_space<vmem>>, %arg4: memref<1x1x16xf32, #tpu.memory_space<vmem>>, %arg5: memref<16x4xf32, #tpu.memory_space<vmem>>, %arg6: memref<1x128x4xf32, #tpu.memory_space<vmem>>, %arg7: memref<1x1x2x4xf32, #tpu.memory_space<vmem>>) attributes {dimension_semantics = [#tpu.dimension_semantics<parallel>, #tpu.dimension_semantics<parallel>], iteration_bounds = array<i64: 2, 2>, scalar_prefetch = 0 : i64, scratch_operands = 0 : i64, tpu.core_type = #tpu.core_type<tc>, window_params = [{transform_indices = @transform_0, window_bounds = array<i64: 1, 128, 16>}, {pipeline_mode = #tpu.pipeline_mode<synchronous>, transform_indices = @transform_1, window_bounds = array<i64: 2, 16>}, {transform_indices = @transform_2, window_bounds = array<i64: 1, 1, 16>}, {pipeline_mode = #tpu.pipeline_mode<synchronous>, transform_indices = @transform_3, window_bounds = array<i64: 16, 4>}, {transform_indices = @transform_4, window_bounds = array<i64: 1, 128, 4>}, {transform_indices = @transform_5, window_bounds = array<i64: 1, 1, 2, 4>}]} {
    %c0 = arith.constant 0 : index
    %c0_0 = arith.constant 0 : index
    %0 = vector.load %arg3[%c0, %c0_0] : memref<2x16xf32, #tpu.memory_space<vmem>>, vector<1x16xf32>
    %c1 = arith.constant 1 : index
    %c0_1 = arith.constant 0 : index
    %1 = vector.load %arg3[%c1, %c0_1] : memref<2x16xf32, #tpu.memory_space<vmem>>, vector<1x16xf32>
    %c0_2 = arith.constant 0 : index
    %c0_3 = arith.constant 0 : index
    %c0_4 = arith.constant 0 : index
    %2 = vector.load %arg2[%c0_2, %c0_3, %c0_4] : memref<1x128x16xf32, #tpu.memory_space<vmem>>, vector<1x128x16xf32>
    %3 = vector.shape_cast %2 : vector<1x128x16xf32> to vector<128x16xf32>
    %4 = vector.broadcast %0 : vector<1x16xf32> to vector<128x16xf32>
    %5 = arith.mulf %3, %4 : vector<128x16xf32>
    %6 = vector.broadcast %1 : vector<1x16xf32> to vector<128x16xf32>
    %7 = arith.addf %5, %6 : vector<128x16xf32>
    %8 = arith.negf %7 : vector<128x16xf32>
    %9 = math.exp %8 : vector<128x16xf32>
    %cst = arith.constant 1.000000e+00 : f32
    %10 = vector.broadcast %cst : f32 to vector<128x16xf32>
    %11 = arith.addf %10, %9 : vector<128x16xf32>
    %12 = arith.divf %10, %11 : vector<128x16xf32>
    %13 = arith.mulf %7, %12 : vector<128x16xf32>
    %c0_5 = arith.constant 0 : index
    %c0_6 = arith.constant 0 : index
    %c0_7 = arith.constant 0 : index
    %14 = vector.load %arg4[%c0_5, %c0_6, %c0_7] : memref<1x1x16xf32, #tpu.memory_space<vmem>>, vector<1x1x16xf32>
    %15 = vector.shape_cast %14 : vector<1x1x16xf32> to vector<1x16xf32>
    %16 = vector.broadcast %15 : vector<1x16xf32> to vector<128x16xf32>
    %17 = arith.mulf %13, %16 : vector<128x16xf32>
    %c0_8 = arith.constant 0 : index
    %c0_9 = arith.constant 0 : index
    %18 = vector.load %arg5[%c0_8, %c0_9] : memref<16x4xf32, #tpu.memory_space<vmem>>, vector<16x4xf32>
    %cst_10 = arith.constant dense<0.000000e+00> : vector<128x4xf32>
    %19 = tpu.matmul %17, %18, %cst_10 {dimension_numbers = #tpu.dot_dimension_numbers<[1], [0], [0], [1], [0, 0, 1, 1], [], []>} : vector<128x16xf32>, vector<16x4xf32>, vector<128x4xf32> -> vector<128x4xf32>
    %c0_11 = arith.constant 0 : index
    %c0_12 = arith.constant 0 : index
    %c0_13 = arith.constant 0 : index
    %20 = vector.load %arg6[%c0_11, %c0_12, %c0_13] : memref<1x128x4xf32, #tpu.memory_space<vmem>>, vector<1x128x4xf32>
    %21 = vector.shape_cast %20 : vector<1x128x4xf32> to vector<128x4xf32>
    %22 = vector.shape_cast %19 : vector<128x4xf32> to vector<1x128x4xf32>
    tpu.vector_store %arg6[%c0_11, %c0_12, %c0_13], %22 {strides = array<i32>} : memref<1x128x4xf32, #tpu.memory_space<vmem>>, vector<1x128x4xf32>,
    %cst_14 = arith.constant dense<0.000000e+00> : vector<4xf32>
    %23 = vector.multi_reduction <add>, %19, %cst_14 [0] : vector<128x4xf32> to vector<4xf32>
    %24 = vector.shape_cast %23 : vector<4xf32> to vector<1x4xf32>
    %cst_15 = arith.constant 7.812500e-03 : f32
    %25 = vector.broadcast %cst_15 : f32 to vector<1x4xf32>
    %26 = arith.mulf %24, %25 : vector<1x4xf32>
    %27 = vector.broadcast %26 : vector<1x4xf32> to vector<128x4xf32>
    %28 = arith.subf %19, %27 : vector<128x4xf32>
    %c0_16 = arith.constant 0 : index
    %c0_17 = arith.constant 0 : index
    %c0_18 = arith.constant 0 : index
    %c0_19 = arith.constant 0 : index
    %29 = vector.load %arg7[%c0_16, %c0_17, %c0_18, %c0_19] : memref<1x1x2x4xf32, #tpu.memory_space<vmem>>, vector<1x1x1x4xf32>
    %30 = vector.shape_cast %29 : vector<1x1x1x4xf32> to vector<1x4xf32>
    %31 = vector.shape_cast %26 : vector<1x4xf32> to vector<1x1x1x4xf32>
    tpu.vector_store %arg7[%c0_16, %c0_17, %c0_18, %c0_19], %31 {strides = array<i32>} : memref<1x1x2x4xf32, #tpu.memory_space<vmem>>, vector<1x1x1x4xf32>,
    %32 = arith.mulf %28, %28 : vector<128x4xf32>
    %cst_20 = arith.constant dense<0.000000e+00> : vector<4xf32>
    %33 = vector.multi_reduction <add>, %32, %cst_20 [0] : vector<128x4xf32> to vector<4xf32>
    %34 = vector.shape_cast %33 : vector<4xf32> to vector<1x4xf32>
    %c0_21 = arith.constant 0 : index
    %c0_22 = arith.constant 0 : index
    %c1_23 = arith.constant 1 : index
    %c0_24 = arith.constant 0 : index
    %35 = vector.load %arg7[%c0_21, %c0_22, %c1_23, %c0_24] : memref<1x1x2x4xf32, #tpu.memory_space<vmem>>, vector<1x1x1x4xf32>
    %36 = vector.shape_cast %35 : vector<1x1x1x4xf32> to vector<1x4xf32>
    %37 = vector.shape_cast %34 : vector<1x4xf32> to vector<1x1x1x4xf32>
    tpu.vector_store %arg7[%c0_21, %c0_22, %c1_23, %c0_24], %37 {strides = array<i32>} : memref<1x1x2x4xf32, #tpu.memory_space<vmem>>, vector<1x1x1x4xf32>,
    return
  }
  func.func @transform_0(%arg0: i32, %arg1: i32) -> (i32, i32, i32) {
    %c0_i32 = arith.constant 0 : i32
    %c0_i32_0 = arith.constant 0 : i32
    return %arg0, %arg1, %c0_i32 : i32, i32, i32
  }
  func.func @transform_1(%arg0: i32, %arg1: i32) -> (i32, i32) {
    %c0_i32 = arith.constant 0 : i32
    %c0_i32_0 = arith.constant 0 : i32
    %c0_i32_1 = arith.constant 0 : i32
    return %c0_i32, %c0_i32_0 : i32, i32
  }
  func.func @transform_2(%arg0: i32, %arg1: i32) -> (i32, i32, i32) {
    %c0_i32 = arith.constant 0 : i32
    %c0_i32_0 = arith.constant 0 : i32
    %c0_i32_1 = arith.constant 0 : i32
    return %arg0, %c0_i32, %c0_i32_0 : i32, i32, i32
  }
  func.func @transform_3(%arg0: i32, %arg1: i32) -> (i32, i32) {
    %c0_i32 = arith.constant 0 : i32
    %c0_i32_0 = arith.constant 0 : i32
    %c0_i32_1 = arith.constant 0 : i32
    return %c0_i32, %c0_i32_0 : i32, i32
  }
  func.func @transform_4(%arg0: i32, %arg1: i32) -> (i32, i32, i32) {
    %c0_i32 = arith.constant 0 : i32
    %c0_i32_0 = arith.constant 0 : i32
    return %arg0, %arg1, %c0_i32 : i32, i32, i32
  }
  func.func @transform_5(%arg0: i32, %arg1: i32) -> (i32, i32, i32, i32) {
    %c0_i32 = arith.constant 0 : i32
    %c0_i32_0 = arith.constant 0 : i32
    %c0_i32_1 = arith.constant 0 : i32
    return %arg0, %arg1, %c0_i32, %c0_i32_0 : i32, i32, i32, i32
  }
}

</mosaic_0001>

<bundles_post_ra>
// kernel: mbconv_forward.4
= control target key start
LH: loop header
LB: loop body
LE: loop exit
PB: predicated region body
PF: predicated region fallthrough
CT: control target
= control target key end

     0   :  { %s724_s12 = smov 0   ;;  %s907_s0 = inlined_call_operand.vmem [shape: f32[512,4], index: 0, kind: input, shape index: {}]   ;;  %s908_s1 = inlined_call_operand.vmem [shape: f32[4,16], index: 1, kind: input, shape index: {}]   ;;  %s909_s2 = inlined_call_operand.vmem [shape: f32[512,16], index: 2, kind: output, shape index: {0}]   ;;  %s910_s3 = inlined_call_operand.vmem [shape: f32[4,2,16], index: 3, kind: output, shape index: {1}]  }
   0x1 LB: > { %s730_s13 = sadd.s32 4294967295, %s702_s12   ;;  %p618_p0 = scmp.ge.s32.totalorder %s702_s12, 1  ;;  %s702_s12 = sphi %s724_s12, %s14_s12  }
   0x2   : > { %p141_p1 = scmp.lt.s32.totalorder %s702_s12, 5 }
   0x4   : > { %p142_p2 = pnand %p618_p0, %p141_p1 }
   0x5   : > { %s619_s16 = sshll.u32 (!%p142_p2), %s730_s13, 4  ;;  %p181_p4 = scmp.lt.s32.totalorder (!%p142_p2), %s730_s13, 3 }
   0x6   : > { %145 = sbr.rel (%p142_p2) target bundleno = 306 (0x132), region = 28  ;;  %p170_p3 = scmp.lt.s32.totalorder (!%p142_p2), %s619_s16, 63 }
   0xb   : > { %v201_v0 = vld [vmem:[%s908_s1] sm:$0xf]  ;;  %vm251_vm0 = vcmask 1043456   ;;  %s912_s16 = smov (!%p170_p3, %s619_s16), 63  ;;  %vm202_vm1 = vcmask 31744   ;;  %vm400_vm2 = vcmask 130048  }
   0xc   : > { %660 = vmatprep.subr.msk.mxu0 %vm251_vm0, %v201_v0  ;;  %686 = vmatprep.subr.msk.mxu1 %vm251_vm0, %v201_v0  ;;  %s620_s17 = sshll.u32 %s912_s16, 3  ;;  %s914_s13 = smov (!%p181_p4, %s730_s13), 3  ;;  %vm471_vm3 = vcmask 122880  }
   0xd   : > { %661 = vmatpush3.msk.msra.mxu0 %vm251_vm0, %v201_v0  ;;  %687 = vmatpush3.msk.msra.mxu1 %vm251_vm0, %v201_v0  ;;  %s173_s20 = scalar_lea.vmem %s907_s0, %s620_s17  ;;  %s767_s23 = scalar_lea.vmem %s909_s2, %s620_s17 }
   0xe   : > { %v185_v1 = vld [vmem:[%s173_s20] sm:$0xff]  ;;  %v186_v2 = vld [vmem:[%s173_s20 + $0x8] sm:$0xff]  ;;  %v187_v3 = vld [vmem:[%s173_s20 + $0x10] sm:$0xff]  ;;  %s623_s24 = sshll.u32 %s914_s13, 1 }
   0xf   : > { %662 = vmatprep.mubr.msk.f32.mxu0 %vm202_vm1, %v185_v1  ;;  %v193_v4 = vld [vmem:[%s173_s20 + $0x40] sm:$0xff]  ;;  %v188_v5 = vld [vmem:[%s173_s20 + $0x18] sm:$0xff]  ;;  %v194_v6 = vld [vmem:[%s173_s20 + $0x48] sm:$0xff]  ;;  %s870_s27 = scalar_lea.vmem %s910_s3, %s623_s24 }
  0x10   : > { %663 = vmatmul.mubr.msk.f32.vlgmr.msra.gmra.mxu0 %vm202_vm1, %v186_v2  ;;  %674 = vmatprep.mubr.msk.f32.mxu1 %vm202_vm1, %v193_v4  ;;  %v195_v7 = vld [vmem:[%s173_s20 + $0x50] sm:$0xff]  ;;  %v189_v8 = vld [vmem:[%s173_s20 + $0x20] sm:$0xff]  ;;  %v196_v9 = vld [vmem:[%s173_s20 + $0x58] sm:$0xff] }
  0x11   : > { %665 = vmatprep.mubr.msk.f32.mxu0 %vm202_vm1, %v187_v3  ;;  %675 = vmatmul.mubr.msk.f32.vlgmr.msra.gmra.mxu1 %vm202_vm1, %v194_v6  ;;  %v197_v10 = vld [vmem:[%s173_s20 + $0x60] sm:$0xff]  ;;  %v190_v11 = vld [vmem:[%s173_s20 + $0x28] sm:$0xff]  ;;  %v191_v12 = vld [vmem:[%s173_s20 + $0x30] sm:$0xff] }
  0x12   : > { %677 = vmatprep.mubr.msk.f32.mxu1 %vm202_vm1, %v195_v7  ;;  %v198_v13 = vld [vmem:[%s173_s20 + $0x68] sm:$0xff]  ;;  %v199_v14 = vld [vmem:[%s173_s20 + $0x70] sm:$0xff]  ;;  %v192_v15 = vld [vmem:[%s173_s20 + $0x38] sm:$0xff] }
  0x13   : > { %v200_v16 = vld [vmem:[%s173_s20 + $0x78] sm:$0xff] }
  0x14   : > { %666 = vmatmul.mubr.msk.f32.gmra.mxu0 %vm202_vm1, %v188_v5 }
  0x15   : > { %668 = vmatprep.mubr.msk.f32.mxu0 %vm202_vm1, %v189_v8  ;;  %678 = vmatmul.mubr.msk.f32.gmra.mxu1 %vm202_vm1, %v196_v9 }
  0x16   : > { %680 = vmatprep.mubr.msk.f32.mxu1 %vm202_vm1, %v197_v10 }
  0x18   : > { %669 = vmatmul.mubr.msk.f32.gmra.mxu0 %vm202_vm1, %v190_v11 }
  0x19   : > { %671 = vmatprep.mubr.msk.f32.mxu0 %vm202_vm1, %v191_v12  ;;  %681 = vmatmul.mubr.msk.f32.gmra.mxu1 %vm202_vm1, %v198_v13 }
  0x1a   : > { %683 = vmatprep.mubr.msk.f32.mxu1 %vm202_vm1, %v199_v14 }
  0x1c   : > { %672 = vmatmul.mubr.msk.f32.gmra.mxu0 %vm202_vm1, %v192_v15 }
  0x1d   : > { %684 = vmatmul.mubr.msk.f32.gmra.mxu1 %vm202_vm1, %v200_v16 }
  0xd0   : > { %v769_v17 = vpop.f32.mrf.mxu0 }
  0xd1   : > { %402 = vst.msk [vmem:[%s767_s23 + $0x8] sm:$0xff] %vm400_vm2, %v769_v17  ;;  %v776_v19 = vpop.f32.mrf.mxu1  ;;  %v418_v23 = vsel %vm400_vm2, %v769_v17, 0.0 }
  0xd2   : > { %v774_v18 = vpop.f32.mrf.mxu0  ;;  %410 = vst.msk [vmem:[%s767_s23 + $0x48] sm:$0xff] %vm400_vm2, %v776_v19  ;;  %v434_v50 = vsel %vm400_vm2, %v776_v19, 0.0 }
  0xd3   : > { %401 = vst.msk [vmem:[%s767_s23] sm:$0xff] %vm400_vm2, %v774_v18  ;;  %v417_v20 = vsel %vm400_vm2, %v774_v18, 0.0  ;;  %v788_v22 = vpop.f32.mrf.mxu1 }
  0xd4   : > { %v786_v21 = vpop.f32.mrf.mxu0  ;;  %409 = vst.msk [vmem:[%s767_s23 + $0x40] sm:$0xff] %vm400_vm2, %v788_v22  ;;  %v419_v24 = vadd.f32 %v418_v23, %v417_v20  ;;  %v432_v48 = vsel %vm400_vm2, %v788_v22, 0.0 }
  0xd5   : > { %404 = vst.msk [vmem:[%s767_s23 + $0x18] sm:$0xff] %vm400_vm2, %v786_v21  ;;  %v800_v26 = vpop.f32.mrf.mxu1  ;;  %v422_v31 = vsel %vm400_vm2, %v786_v21, 0.0 }
  0xd6   : > { %v798_v25 = vpop.f32.mrf.mxu0  ;;  %412 = vst.msk [vmem:[%s767_s23 + $0x58] sm:$0xff] %vm400_vm2, %v800_v26  ;;  %v438_v54 = vsel %vm400_vm2, %v800_v26, 0.0 }
  0xd7   : > { %403 = vst.msk [vmem:[%s767_s23 + $0x10] sm:$0xff] %vm400_vm2, %v798_v25  ;;  %v420_v27 = vsel %vm400_vm2, %v798_v25, 0.0  ;;  %v812_v30 = vpop.f32.mrf.mxu1 }
  0xd8   : > { %v421_v28 = vadd.f32 %v420_v27, %v419_v24  ;;  %v810_v29 = vpop.f32.mrf.mxu0  ;;  %411 = vst.msk [vmem:[%s767_s23 + $0x50] sm:$0xff] %vm400_vm2, %v812_v30  ;;  %v436_v52 = vsel %vm400_vm2, %v812_v30, 0.0 }
  0xd9   : > { %406 = vst.msk [vmem:[%s767_s23 + $0x28] sm:$0xff] %vm400_vm2, %v810_v29  ;;  %v682_v34 = vpop.f32.mrf.mxu1  ;;  %v426_v39 = vsel %vm400_vm2, %v810_v29, 0.0 }
  0xda   : > { %v341_v32 = vpop.f32.mrf.mxu0  ;;  %v423_v33 = vadd.f32 %v422_v31, %v421_v28  ;;  %414 = vst.msk [vmem:[%s767_s23 + $0x68] sm:$0xff] %vm400_vm2, %v682_v34  ;;  %v442_v58 = vsel %vm400_vm2, %v682_v34, 0.0 }
  0xdb   : > { %405 = vst.msk [vmem:[%s767_s23 + $0x20] sm:$0xff] %vm400_vm2, %v341_v32  ;;  %v424_v35 = vsel %vm400_vm2, %v341_v32, 0.0  ;;  %v829_v38 = vpop.f32.mrf.mxu1 }
  0xdc   : > { %v425_v36 = vadd.f32 %v424_v35, %v423_v33  ;;  %v827_v37 = vpop.f32.mrf.mxu0  ;;  %413 = vst.msk [vmem:[%s767_s23 + $0x60] sm:$0xff] %vm400_vm2, %v829_v38  ;;  %v440_v56 = vsel %vm400_vm2, %v829_v38, 0.0 }
  0xdd   : > { %408 = vst.msk [vmem:[%s767_s23 + $0x38] sm:$0xff] %vm400_vm2, %v827_v37  ;;  %v685_v42 = vpop.f32.mrf.mxu1  ;;  %v430_v46 = vsel %vm400_vm2, %v827_v37, 0.0 }
  0xde   : > { %v351_v40 = vpop.f32.mrf.mxu0  ;;  %v427_v41 = vadd.f32 %v426_v39, %v425_v36  ;;  %416 = vst.msk [vmem:[%s767_s23 + $0x78] sm:$0xff] %vm400_vm2, %v685_v42  ;;  %v446_v62 = vsel %vm400_vm2, %v685_v42, 0.0 }
  0xdf   : > { %407 = vst.msk [vmem:[%s767_s23 + $0x30] sm:$0xff] %vm400_vm2, %v351_v40  ;;  %v428_v43 = vsel %vm400_vm2, %v351_v40, 0.0  ;;  %v844_v45 = vpop.f32.mrf.mxu1 }
  0xe0   : > { %v429_v44 = vadd.f32 %v428_v43, %v427_v41  ;;  %415 = vst.msk [vmem:[%s767_s23 + $0x70] sm:$0xff] %vm400_vm2, %v844_v45  ;;  %v444_v60 = vsel %vm400_vm2, %v844_v45, 0.0 }
  0xe2   : > { %v431_v47 = vadd.f32 %v430_v46, %v429_v44 }
  0xe4   : > { %v433_v49 = vadd.f32 %v432_v48, %v431_v47 }
  0xe6   : > { %v435_v51 = vadd.f32 %v434_v50, %v433_v49 }
  0xe8   : > { %v437_v53 = vadd.f32 %v436_v52, %v435_v51 }
  0xea   : > { %v439_v55 = vadd.f32 %v438_v54, %v437_v53 }
  0xec   : > { %v441_v57 = vadd.f32 %v440_v56, %v439_v55 }
  0xee   : > { %v443_v59 = vadd.f32 %v442_v58, %v441_v57 }
  0xf0   : > { %v445_v61 = vadd.f32 %v444_v60, %v443_v59 }
  0xf2   : > { %v447_v63 = vadd.f32 %v446_v62, %v445_v61 }
  0xf4   : > { %v448_v0 = vrot.slane %v447_v63, 4 }
  0xf6   : > { %v449_v1 = vadd.f32 %v448_v0, %v447_v63 }
  0xf8   : > { %v450_v2 = vrot.slane %v449_v1, 2 }
  0xfa   : > { %v451_v3 = vadd.f32 %v450_v2, %v449_v1 }
  0xfc   : > { %v452_v4 = vrot.slane %v451_v3, 1 }
  0xfe   : > { %v453_v5 = vadd.f32 %v452_v4, %v451_v3 }
 0x100   : > { %v454_v6 = vmul.f32 0.0078125, %v453_v5 }
 0x102   : > { %v455_v7 = vsub.f32 %v774_v18, %v454_v6  ;;  %v456_v8 = vsub.f32 %v769_v17, %v454_v6  ;;  %472 = vst.msk [vmem:[%s870_s27] sm:$0x1] %vm471_vm3, %v454_v6  ;;  %v457_v9 = vsub.f32 %v798_v25, %v454_v6  ;;  %v464_v10 = vsub.f32 %v776_v19, %v454_v6 }
 0x103   : > { %v466_v11 = vsub.f32 %v800_v26, %v454_v6  ;;  %v468_v12 = vsub.f32 %v682_v34, %v454_v6  ;;  %v458_v13 = vsub.f32 %v786_v21, %v454_v6  ;;  %v470_v14 = vsub.f32 %v685_v42, %v454_v6 }
 0x104   : > { %v473_v15 = vmul.f32 %v455_v7, %v455_v7  ;;  %v474_v16 = vmul.f32 %v456_v8, %v456_v8  ;;  %v459_v20 = vsub.f32 %v341_v32, %v454_v6  ;;  %v475_v23 = vmul.f32 %v457_v9, %v457_v9 }
 0x105   : > { %v482_v24 = vmul.f32 %v464_v10, %v464_v10  ;;  %v460_v18 = vsub.f32 %v810_v29, %v454_v6  ;;  %v484_v17 = vmul.f32 %v466_v11, %v466_v11  ;;  %v486_v27 = vmul.f32 %v468_v12, %v468_v12 }
 0x106   : > { %v476_v28 = vmul.f32 %v458_v13, %v458_v13  ;;  %v488_v31 = vmul.f32 %v470_v14, %v470_v14  ;;  %v489_v25 = vsel %vm400_vm2, %v473_v15, 0.0  ;;  %v490_v19 = vsel %vm400_vm2, %v474_v16, 0.0 }
 0x107   : > { %v491_v26 = vadd.f32 %v490_v19, %v489_v25  ;;  %v461_v33 = vsub.f32 %v351_v40, %v454_v6  ;;  %v477_v34 = vmul.f32 %v459_v20, %v459_v20  ;;  %v492_v21 = vsel %vm400_vm2, %v475_v23, 0.0 }
 0x108   : > { %v506_v35 = vsel %vm400_vm2, %v482_v24, 0.0  ;;  %v510_v36 = vsel %vm400_vm2, %v484_v17, 0.0  ;;  %v514_v29 = vsel %vm400_vm2, %v486_v27, 0.0  ;;  %v462_v39 = vsub.f32 %v827_v37, %v454_v6 }
 0x109   : > { %v493_v32 = vadd.f32 %v492_v21, %v491_v26  ;;  %v478_v41 = vmul.f32 %v460_v18, %v460_v18  ;;  %v494_v42 = vsel %vm400_vm2, %v476_v28, 0.0  ;;  %v518_v43 = vsel %vm400_vm2, %v488_v31, 0.0 }
 0x10a   : > { %v463_v40 = vsub.f32 %v788_v22, %v454_v6  ;;  %v479_v46 = vmul.f32 %v461_v33, %v461_v33  ;;  %v496_v47 = vsel %vm400_vm2, %v477_v34, 0.0  ;;  %v480_v49 = vmul.f32 %v462_v39, %v462_v39 }
 0x10b   : > { %v495_v44 = vadd.f32 %v494_v42, %v493_v32  ;;  %v498_v50 = vsel %vm400_vm2, %v478_v41, 0.0  ;;  %v465_v52 = vsub.f32 %v812_v30, %v454_v6  ;;  %v467_v57 = vsub.f32 %v829_v38, %v454_v6 }
 0x10c   : > { %v481_v53 = vmul.f32 %v463_v40, %v463_v40  ;;  %v500_v37 = vsel %vm400_vm2, %v479_v46, 0.0  ;;  %v502_v55 = vsel %vm400_vm2, %v480_v49, 0.0  ;;  %v469_v61 = vsub.f32 %v844_v45, %v454_v6 }
 0x10d   : > { %v497_v48 = vadd.f32 %v496_v47, %v495_v44  ;;  %v483_v22 = vmul.f32 %v465_v52, %v465_v52  ;;  %v485_v62 = vmul.f32 %v467_v57, %v467_v57 }
 0x10e   : > { %v504_v58 = vsel %vm400_vm2, %v481_v53, 0.0  ;;  %v487_v1 = vmul.f32 %v469_v61, %v469_v61 }
 0x10f   : > { %v499_v51 = vadd.f32 %v498_v50, %v497_v48  ;;  %v508_v63 = vsel %vm400_vm2, %v483_v22, 0.0  ;;  %v512_v2 = vsel %vm400_vm2, %v485_v62, 0.0 }
 0x110   : > { %v516_v38 = vsel %vm400_vm2, %v487_v1, 0.0 }
 0x111   : > { %v501_v54 = vadd.f32 %v500_v37, %v499_v51 }
 0x113   : > { %v503_v56 = vadd.f32 %v502_v55, %v501_v54 }
 0x115   : > { %v505_v59 = vadd.f32 %v504_v58, %v503_v56 }
 0x117   : > { %v507_v60 = vadd.f32 %v506_v35, %v505_v59 }
 0x119   : > { %v509_v30 = vadd.f32 %v508_v63, %v507_v60 }
 0x11b   : > { %v511_v0 = vadd.f32 %v510_v36, %v509_v30 }
 0x11d   : > { %v513_v3 = vadd.f32 %v512_v2, %v511_v0 }
 0x11f   : > { %v515_v4 = vadd.f32 %v514_v29, %v513_v3 }
 0x121   : > { %v517_v5 = vadd.f32 %v516_v38, %v515_v4 }
 0x123   : > { %v519_v7 = vadd.f32 %v518_v43, %v517_v5 }
 0x125   : > { %v520_v8 = vrot.slane %v519_v7, 4 }
 0x127   : > { %v521_v9 = vadd.f32 %v520_v8, %v519_v7 }
 0x129   : > { %v522_v10 = vrot.slane %v521_v9, 2 }
 0x12b   : > { %v523_v11 = vadd.f32 %v522_v10, %v521_v9 }
 0x12d   : > { %v524_v45 = vrot.slane %v523_v11, 1 }
 0x12f   : > { %v525_v6 = vadd.f32 %v524_v45, %v523_v11 }
 0x131   : > { %526 = vst.msk [vmem:[%s870_s27 + $0x1] sm:$0x1] %vm471_vm3, %v525_v6 }
 0x132 PF: > { %s14_s12 = sadd.s32 1, %s702_s12  }
 0x133   : > { %p11_p5 = scmp.ge.s32.totalorder %s14_s12, 6  }
 0x135   :  { %13 = sbr.rel (!%p11_p5) target bundleno = 1 (0x1), region = 70 }

// kernel: mbconv_forward.6
= control target key start
LH: loop header
LB: loop body
LE: loop exit
PB: predicated region body
PF: predicated region fallthrough
CT: control target
= control target key end

     0   :  { %s527_s9 = smov 0   ;;  %s529_s10 = smov 0   ;;  %s609_s0 = inlined_call_operand.vmem [shape: f32[2,16,16,16], index: 0, kind: input, shape index: {}]   ;;  %s610_s1 = inlined_call_operand.vmem [shape: f32[2,16], index: 1, kind: input, shape index: {}]   ;;  %s611_s2 = inlined_call_operand.vmem [shape: f32[2,4,1,16], index: 2, kind: output, shape index: {}]  }
   0x1   :  { %s531_s11 = smov 0   ;;  %s533_s12 = smov 0  }
   0x2   :  { %s535_s13 = smov 0  }
   0x3 LB: > { %s21_s14 = sadd.s32 1, %s502_s11  ;;  %s24_s15 = sadd.s32 1, %s506_s12  ;;  %s510_s13 = sphi %s535_s13, %s12_s13   ;;  %s506_s12 = sphi %s533_s12, %s615_s12   ;;  %s502_s11 = sphi %s531_s11, %s614_s11   ;;  %s498_s10 = sphi %s529_s10, %s613_s10   ;;  %s494_s9 = sphi %s527_s9, %s612_s9  }
   0x4   : > { %p22_p0 = scmp.ge.s32.totalorder %s21_s14, 4  ;;  %p382_p1 = scmp.ge.s32.totalorder %s510_s13, 1 }
   0x5   : > { %p134_p2 = scmp.lt.s32.totalorder %s510_s13, 9 }
   0x6   : > { %s617_s14 = smov (%p22_p0, %s21_s14), 0  ;;  %s619_s15 = smov (!%p22_p0, %s24_s15), %s506_s12 }
   0x7   : > { %p135_p3 = pnand %p382_p1, %p134_p2  ;;  %p26_p4 = scmp.ge.s32.totalorder %s619_s15, 2 }
   0x8   : > { %s383_s16 = sshll.u32 (!%p135_p3), %s494_s9, 2  ;;  %p164_p5 = scmp.lt.s32.totalorder (!%p135_p3), %s498_s10, 1 }
   0x9   : > { %s621_s15 = smov (%p26_p4, %s619_s15), 0  ;;  %138 = sbr.rel (%p135_p3) target bundleno = 87 (0x57), region = 28 }
   0xa   : > { %p166_p6 = scmp.lt.s32.totalorder (!%p135_p3), %s383_s16, 15  ;;  %p176_p7 = scmp.lt.s32.totalorder (!%p135_p3), %s494_s9, 3 }
   0xe   : > { %s623_s10 = smov (!%p164_p5, %s498_s10), 1  ;;  %s625_s16 = smov (!%p166_p6, %s383_s16), 15  ;;  %v388_v0 = vld [vmem:[%s610_s1] ss:$0 sm:$0xff]  ;;  %v389_v1 = vld [vmem:[%s610_s1 + $0x1] ss:$0 sm:$0xff] }
   0xf   : > { %s385_s17 = sshll.u32 %s623_s10, 5  ;;  %s384_s18 = sshll.u32 %s625_s16, 1  ;;  %vm271_vm0 = vcmask 130048   ;;  %vm293_vm1 = vcmask 122880  }
  0x10   : > { %s170_s19 = sadd.s32 %s385_s17, %s384_s18  ;;  %s627_s9 = smov (!%p176_p7, %s494_s9), 3 }
  0x11   : > { %s386_s20 = sshll.u32 %s170_s19, 3  ;;  %s387_s28 = sshll.u32 %s623_s10, 2 }
  0x12   : > { %s172_s25 = scalar_lea.vmem %s609_s0, %s386_s20  ;;  %s179_s29 = sadd.s32 %s387_s28, %s627_s9 }
  0x13   : > { %v183_v2 = vld [vmem:[%s172_s25] sm:$0xff]  ;;  %v184_v3 = vld [vmem:[%s172_s25 + $0x8] sm:$0xff]  ;;  %v185_v4 = vld [vmem:[%s172_s25 + $0x10] sm:$0xff]  ;;  %s180_s4 = scalar_lea.vmem %s611_s2, %s179_s29 }
  0x14   : > { %v186_v5 = vld [vmem:[%s172_s25 + $0x18] sm:$0xff]  ;;  %v187_v6 = vld [vmem:[%s172_s25 + $0x20] sm:$0xff]  ;;  %v188_v7 = vld [vmem:[%s172_s25 + $0x28] sm:$0xff]  ;;  %v195_v8 = vmul.f32 %v388_v0, %v183_v2  ;;  %v196_v9 = vmul.f32 %v388_v0, %v184_v3  ;;  %v197_v10 = vmul.f32 %v388_v0, %v185_v4 }
  0x15   : > { %v189_v11 = vld [vmem:[%s172_s25 + $0x30] sm:$0xff]  ;;  %v190_v12 = vld [vmem:[%s172_s25 + $0x38] sm:$0xff]  ;;  %v198_v13 = vmul.f32 %v388_v0, %v186_v5  ;;  %v199_v14 = vmul.f32 %v388_v0, %v187_v6  ;;  %v200_v15 = vmul.f32 %v388_v0, %v188_v7 }
  0x16   : > { %v201_v16 = vmul.f32 %v388_v0, %v189_v11  ;;  %v202_v17 = vmul.f32 %v388_v0, %v190_v12  ;;  %v207_v18 = vadd.f32 %v389_v1, %v195_v8  ;;  %v208_v19 = vadd.f32 %v389_v1, %v196_v9 }
  0x17   : > { %v209_v20 = vadd.f32 %v389_v1, %v197_v10  ;;  %v210_v21 = vadd.f32 %v389_v1, %v198_v13  ;;  %v211_v22 = vadd.f32 %v389_v1, %v199_v14  ;;  %v212_v23 = vadd.f32 %v389_v1, %v200_v15 }
  0x18   : > { %v572_v24 = vadd.f32 %v389_v1, %v201_v16  ;;  %v390_v25 = vmul.f32 -1.442695, %v207_v18  ;;  %v391_v26 = vmul.f32 -1.442695, %v208_v19  ;;  %v574_v27 = vadd.f32 %v389_v1, %v202_v17 }
  0x19   : > { %v392_v28 = vmul.f32 -1.442695, %v209_v20  ;;  %v393_v29 = vmul.f32 -1.442695, %v210_v21  ;;  %v394_v30 = vmul.f32 -1.442695, %v211_v22 }
  0x1a   : > { %440 = vpow2.f32 %v390_v25  ;;  %v395_v31 = vmul.f32 -1.442695, %v212_v23  ;;  %v396_v32 = vmul.f32 -1.442695, %v572_v24  ;;  %v397_v33 = vmul.f32 -1.442695, %v574_v27 }
  0x1b   : > { %442 = vpow2.f32 %v391_v26 }
  0x1c   : > { %444 = vpow2.f32 %v392_v28 }
  0x1d   : > { %446 = vpow2.f32 %v393_v29 }
  0x1e   : > { %448 = vpow2.f32 %v394_v30 }
  0x1f   : > { %450 = vpow2.f32 %v395_v31 }
  0x20   : > { %452 = vpow2.f32 %v396_v32 }
  0x21   : > { %454 = vpow2.f32 %v397_v33 }
  0x27   : > { %v441_v34 = vpop.eup %440 }
  0x28   : > { %v443_v35 = vpop.eup %442  ;;  %v239_v36 = vadd.f32 1.0, %v441_v34 }
  0x29   : > { %v445_v37 = vpop.eup %444  ;;  %v240_v38 = vadd.f32 1.0, %v443_v35 }
  0x2a   : > { %v447_v39 = vpop.eup %446  ;;  %v241_v40 = vadd.f32 1.0, %v445_v37  ;;  %456 = vrcp.f32 %v239_v36 }
  0x2b   : > { %v449_v41 = vpop.eup %448  ;;  %v242_v42 = vadd.f32 1.0, %v447_v39  ;;  %458 = vrcp.f32 %v240_v38 }
  0x2c   : > { %v451_v43 = vpop.eup %450  ;;  %v243_v44 = vadd.f32 1.0, %v449_v41  ;;  %460 = vrcp.f32 %v241_v40 }
  0x2d   : > { %v453_v45 = vpop.eup %452  ;;  %v244_v46 = vadd.f32 1.0, %v451_v43  ;;  %462 = vrcp.f32 %v242_v42 }
  0x2e   : > { %v455_v47 = vpop.eup %454  ;;  %v245_v48 = vadd.f32 1.0, %v453_v45  ;;  %464 = vrcp.f32 %v243_v44 }
  0x2f   : > { %v246_v49 = vadd.f32 1.0, %v455_v47  ;;  %466 = vrcp.f32 %v244_v46 }
  0x30   : > { %468 = vrcp.f32 %v245_v48 }
  0x31   : > { %470 = vrcp.f32 %v246_v49 }
  0x37   : > { %v457_v50 = vpop.eup %456 }
  0x38   : > { %v459_v51 = vpop.eup %458  ;;  %v263_v52 = vmul.f32 %v457_v50, %v207_v18 }
  0x39   : > { %v461_v53 = vpop.eup %460  ;;  %v264_v54 = vmul.f32 %v459_v51, %v208_v19 }
  0x3a   : > { %v463_v55 = vpop.eup %462  ;;  %v265_v56 = vmul.f32 %v461_v53, %v209_v20  ;;  %v272_v57 = vsel %vm271_vm0, %v263_v52, 0.0 }
  0x3b   : > { %v465_v58 = vpop.eup %464  ;;  %v266_v59 = vmul.f32 %v463_v55, %v210_v21  ;;  %v273_v60 = vsel %vm271_vm0, %v264_v54, 0.0 }
  0x3c   : > { %v467_v61 = vpop.eup %466  ;;  %v267_v62 = vmul.f32 %v465_v58, %v211_v22  ;;  %v274_v63 = vadd.f32 %v273_v60, %v272_v57  ;;  %v275_v0 = vsel %vm271_vm0, %v265_v56, 0.0 }
  0x3d   : > { %v469_v1 = vpop.eup %468  ;;  %v268_v2 = vmul.f32 %v467_v61, %v212_v23  ;;  %v277_v3 = vsel %vm271_vm0, %v266_v59, 0.0 }
  0x3e   : > { %v471_v4 = vpop.eup %470  ;;  %v276_v5 = vadd.f32 %v275_v0, %v274_v63  ;;  %v269_v6 = vmul.f32 %v469_v1, %v572_v24  ;;  %v279_v7 = vsel %vm271_vm0, %v267_v62, 0.0 }
  0x3f   : > { %v270_v9 = vmul.f32 %v471_v4, %v574_v27  ;;  %v281_v10 = vsel %vm271_vm0, %v268_v2, 0.0 }
  0x40   : > { %v278_v8 = vadd.f32 %v277_v3, %v276_v5  ;;  %v283_v12 = vsel %vm271_vm0, %v269_v6, 0.0 }
  0x41   : > { %v285_v14 = vsel %vm271_vm0, %v270_v9, 0.0 }
  0x42   : > { %v280_v11 = vadd.f32 %v279_v7, %v278_v8 }
  0x44   : > { %v282_v13 = vadd.f32 %v281_v10, %v280_v11 }
  0x46   : > { %v284_v15 = vadd.f32 %v283_v12, %v282_v13 }
  0x48   : > { %v286_v16 = vadd.f32 %v285_v14, %v284_v15 }
  0x4a   : > { %v287_v17 = vrot.slane %v286_v16, 4 }
  0x4c   : > { %v288_v18 = vadd.f32 %v287_v17, %v286_v16 }
  0x4e   : > { %v289_v19 = vrot.slane %v288_v18, 2 }
  0x50   : > { %v290_v20 = vadd.f32 %v289_v19, %v288_v18 }
  0x52   : > { %v291_v21 = vrot.slane %v290_v20, 1 }
  0x54   : > { %v292_v22 = vadd.f32 %v291_v21, %v290_v20 }
  0x56   : > { %294 = vst.msk [vmem:[%s180_s4] sm:$0x1] %vm293_vm1, %v292_v22 }
  0x57 PF: > { %s12_s13 = sadd.s32 1, %s510_s13   ;;  %s612_s9 = smov %s502_s11 }
  0x58   : > { %p9_p8 = scmp.ge.s32.totalorder %s12_s13, 10   ;;  %s613_s10 = smov %s506_s12 }
  0x59   : > { %s614_s11 = smov %s617_s14  ;;  %s615_s12 = smov %s621_s15 }
  0x5a   :  { %11 = sbr.rel (!%p9_p8) target bundleno = 3 (0x3), region = 58 }

// kernel: mbconv_forward.5
= control target key start
LH: loop header
LB: loop body
LE: loop exit
PB: predicated region body
PF: predicated region fallthrough
CT: control target
= control target key end

     0   :  { %s1364_s21 = smov 0   ;;  %s1366_s22 = smov 0   ;;  %s1838_s0 = inlined_call_operand.vmem [shape: f32[2,16,16,16], index: 0, kind: input, shape index: {}, may-alias: {0,1,2}]   ;;  %s1839_s1 = inlined_call_operand.vmem [shape: f32[2,16,16,16], index: 1, kind: input, shape index: {}, may-alias: {0,1,2}]   ;;  %s1840_s2 = inlined_call_operand.vmem [shape: f32[2,16,16,16], index: 2, kind: input, shape index: {}, may-alias: {0,1,2}]   ;;  %s1841_s3 = inlined_call_operand.vmem [shape: f32[2,16], index: 3, kind: input, shape index: {}]   ;;  %s1842_s4 = inlined_call_operand.vmem [shape: f32[9,16], index: 4, kind: input, shape index: {}]   ;;  %s1843_s5 = inlined_call_operand.vmem [shape: f32[2,16,16,16], index: 5, kind: output, shape index: {0}]   ;;  %s1844_s6 = inlined_call_operand.vmem [shape: f32[2,4,2,16], index: 6, kind: output, shape index: {1}]  }
   0x1   :  { %s1368_s23 = smov 0   ;;  %s1370_s24 = smov 0  }
   0x2   :  { %s1372_s25 = smov 0  }
   0x3 LB: > { %s26_s26 = sadd.s32 1, %s1318_s23  ;;  %s29_s27 = sadd.s32 1, %s1322_s24  ;;  %s1326_s25 = sphi %s1372_s25, %s17_s25   ;;  %s1322_s24 = sphi %s1370_s24, %s1849_s24   ;;  %s1318_s23 = sphi %s1368_s23, %s1848_s23   ;;  %s1314_s22 = sphi %s1366_s22, %s1847_s22   ;;  %s1310_s21 = sphi %s1364_s21, %s1846_s21  }
   0x4   : > { %p27_p0 = scmp.ge.s32.totalorder %s26_s26, 4  ;;  %p1138_p1 = scmp.ge.s32.totalorder %s1326_s25, 1 }
   0x5   : > { %p303_p2 = scmp.lt.s32.totalorder %s1326_s25, 9 }
   0x6   : > { %s1851_s26 = smov (%p27_p0, %s26_s26), 0  ;;  %s1853_s27 = smov (!%p27_p0, %s29_s27), %s1322_s24 }
   0x7   : > { %p304_p3 = pnand %p1138_p1, %p303_p2  ;;  %p31_p4 = scmp.ge.s32.totalorder %s1853_s27, 2 }
   0x8   : > { %s1399_s28 = sshll.u32 (!%p304_p3), %s1310_s21, 2  ;;  %p378_p5 = scmp.lt.s32.totalorder (!%p304_p3), %s1314_s22, 1 }
   0x9   : > { %s1855_s27 = smov (%p31_p4, %s1853_s27), 0  ;;  %307 = sbr.rel (%p304_p3) target bundleno = 163 (0xa3), region = 40 }
   0xa   : > { %p380_p6 = scmp.lt.s32.totalorder (!%p304_p3), %s1399_s28, 15  ;;  %s1144_s29 = sadd.s32 (!%p304_p3), 4294967295, %s1399_s28 }
   0xb   : > { %p390_p7 = scmp.gt.s32.totalorder (!%p304_p3), %s1144_s29, 0  ;;  %p1145_p8 = scmp.lt.s32.totalorder (!%p304_p3), %s1144_s29, 15 }
   0xc   : > { %s1198_s13 = sadd.s32 (!%p304_p3), 4, %s1399_s28  ;;  %p574_p10 = scmp.eq.s32.totalorder (!%p304_p3), %s1310_s21, 0 }
   0xd   : > { %p1445_p9 = scmp.lt.s32.totalorder (!%p304_p3), %s1198_s13, 15  ;;  %p599_p11 = scmp.eq.s32.totalorder (!%p304_p3), %s1310_s21, 3 }
   0xe   : > { %vm443_vm0 = vcmask 122880   ;;  %v1328_v0 = vmov 0.0   ;;  %s1857_s22 = smov (!%p378_p5, %s1314_s22), 1  ;;  %v1432_v1 = vld [vmem:[%s1841_s3] ss:$0 sm:$0xff]  ;;  %vm545_vm1 = vcmask 130048  }
   0xf   : > { %445 = vst.msk [vmem:[#allocation2 + $0x27] sm:$0x1] %vm443_vm0, %v1328_v0  ;;  %444 = vst.msk [vmem:[#allocation2 + $0x7] sm:$0x1] %vm443_vm0, %v1328_v0  ;;  %s381_s30 = scalar_select %p380_p6, %s1399_s28, 15 }
  0x10   : > { %446 = vst.msk [vmem:[#allocation2 + $0x47] sm:$0x1] %vm443_vm0, %v1328_v0  ;;  %447 = vst.msk [vmem:[#allocation2 + $0x67] sm:$0x1] %vm443_vm0, %v1328_v0  ;;  %s1423_s7 = sshll.u32 %s1857_s22, 5  ;;  %s1861_s13 = smov (!%p1445_p9, %s1198_s13), 15 }
  0x11   : > { %448 = vst.msk [vmem:[#allocation2 + $0x87] sm:$0x1] %vm443_vm0, %v1328_v0  ;;  %449 = vst.msk [vmem:[#allocation2 + $0xa7] sm:$0x1] %vm443_vm0, %v1328_v0  ;;  %s1140_s8 = sshll.u32 %s381_s30, 1  ;;  %s1863_s13 = smov (!%p1445_p9, %s1861_s13), 15 }
  0x12   : > { %450 = vst.msk [vmem:[#allocation2 + $0x18] sm:$0x1] %vm443_vm0, %v1328_v0  ;;  %451 = vst.msk [vmem:[#allocation2 + $0x38] sm:$0x1] %vm443_vm0, %v1328_v0  ;;  %s1426_s9 = sadd.s32 %s1423_s7, %s1140_s8  ;;  %v1443_v2 = vld [vmem:[%s1841_s3 + $0x1] ss:$0 sm:$0xff] }
  0x13   : > { %452 = vst.msk [vmem:[#allocation2 + $0x58] sm:$0x1] %vm443_vm0, %v1328_v0  ;;  %453 = vst.msk [vmem:[#allocation2 + $0x78] sm:$0x1] %vm443_vm0, %v1328_v0  ;;  %s1142_s10 = sshll.u32 %s1426_s9, 3  ;;  %s1157_s14 = sshll.u32 %s1863_s13, 1 }
  0x14   : > { %454 = vst.msk [vmem:[#allocation2 + $0x98] sm:$0x1] %vm443_vm0, %v1328_v0  ;;  %455 = vst.msk [vmem:[#allocation2 + $0xb8] sm:$0x1] %vm443_vm0, %v1328_v0  ;;  %s386_s16 = scalar_lea.vmem %s1838_s0, %s1142_s10  ;;  %s415_s15 = sadd.s32 %s1157_s14, %s1423_s7 }
  0x15   : > { %v456_v3 = vld [vmem:[%s386_s16] sm:$0xff]  ;;  %v457_v4 = vld [vmem:[%s386_s16 + $0x8] sm:$0xff]  ;;  %v458_v5 = vld [vmem:[%s386_s16 + $0x10] sm:$0xff]  ;;  %s391_s20 = scalar_select %p390_p7, %s1144_s29, 0 }
  0x16   : > { %v468_v6 = vmul.f32 %v1432_v1, %v456_v3  ;;  %v469_v7 = vmul.f32 %v1432_v1, %v457_v4  ;;  %v470_v8 = vmul.f32 %v1432_v1, %v458_v5  ;;  %v459_v9 = vld [vmem:[%s386_s16 + $0x18] sm:$0xff]  ;;  %v460_v10 = vld [vmem:[%s386_s16 + $0x20] sm:$0xff]  ;;  %v461_v11 = vld [vmem:[%s386_s16 + $0x28] sm:$0xff]  ;;  %s1565_s11 = scalar_select %p599_p11, 0.0, 1.0 }
  0x17   : > { %s1859_s20 = smov (!%p1145_p8, %s391_s20), 15  ;;  %v471_v12 = vmul.f32 %v1432_v1, %v459_v9  ;;  %v472_v13 = vmul.f32 %v1432_v1, %v460_v10  ;;  %v473_v14 = vmul.f32 %v1432_v1, %v461_v11  ;;  %v462_v15 = vld [vmem:[%s386_s16 + $0x30] sm:$0xff]  ;;  %v463_v16 = vld [vmem:[%s386_s16 + $0x38] sm:$0xff]  ;;  %s1159_s16 = sshll.u32 %s415_s15, 3 }
  0x18   : > { %v1457_v17 = vadd.f32 %v1443_v2, %v468_v6  ;;  %v1460_v18 = vadd.f32 %v1443_v2, %v469_v7  ;;  %v1463_v19 = vadd.f32 %v1443_v2, %v470_v8  ;;  %s1150_s28 = sshll.u32 %s1859_s20, 1  ;;  %v474_v23 = vmul.f32 %v1432_v1, %v462_v15  ;;  %s417_s19 = scalar_lea.vmem %s1840_s2, %s1159_s16 }
  0x19   : > { %v1470_v20 = vadd.f32 %v1443_v2, %v471_v12  ;;  %v1473_v21 = vadd.f32 %v1443_v2, %v472_v13  ;;  %v1476_v22 = vadd.f32 %v1443_v2, %v473_v14  ;;  %s398_s29 = sadd.s32 %s1150_s28, %s1423_s7  ;;  %v475_v27 = vmul.f32 %v1432_v1, %v463_v16  ;;  %v579_v43 = vld [vmem:[%s417_s19] sm:$0xff]  ;;  %v580_v44 = vld [vmem:[%s417_s19 + $0x8] sm:$0xff]  ;;  %p435_p12 = scmp.lt.s32.totalorder %s1310_s21, 3 }
  0x1a   : > { %v1168_v24 = vmul.f32 -1.442695, %v1457_v17  ;;  %v1169_v25 = vmul.f32 -1.442695, %v1460_v18  ;;  %v1170_v26 = vmul.f32 -1.442695, %v1463_v19  ;;  %v1486_v29 = vadd.f32 %v1443_v2, %v474_v23 }
  0x1b   : > { %s1152_s30 = sshll.u32 %s398_s29, 3  ;;  %v1171_v28 = vmul.f32 -1.442695, %v1470_v20  ;;  %v1172_v30 = vmul.f32 -1.442695, %v1473_v21  ;;  %v1493_v31 = vadd.f32 %v1443_v2, %v475_v27  ;;  %v581_v45 = vmul.f32 %v1432_v1, %v579_v43  ;;  %s1865_s21 = smov (!%p435_p12, %s1310_s21), 3 }
  0x1c   : > { %1240 = vpow2.f32 %v1168_v24  ;;  %s400_s12 = scalar_lea.vmem %s1839_s1, %s1152_s30  ;;  %v1173_v34 = vmul.f32 -1.442695, %v1476_v22  ;;  %v1174_v37 = vmul.f32 -1.442695, %v1486_v29  ;;  %v582_v46 = vmul.f32 %v1432_v1, %v580_v44  ;;  %s1164_s9 = sshll.u32 %s1857_s22, 2 }
  0x1d   : > { %1242 = vpow2.f32 %v1169_v25  ;;  %v554_v32 = vld [vmem:[%s400_s12] sm:$0xff]  ;;  %v555_v33 = vld [vmem:[%s400_s12 + $0x8] sm:$0xff]  ;;  %v1175_v38 = vmul.f32 -1.442695, %v1493_v31  ;;  %v1518_v47 = vadd.f32 %v1443_v2, %v581_v45  ;;  %s1531_s7 = scalar_select %p574_p10, 0.0, 1.0 }
  0x1e   : > { %1244 = vpow2.f32 %v1170_v26  ;;  %v556_v35 = vmul.f32 %v1432_v1, %v554_v32  ;;  %v557_v36 = vmul.f32 %v1432_v1, %v555_v33  ;;  %v1521_v48 = vadd.f32 %v1443_v2, %v582_v46 }
  0x1f   : > { %1246 = vpow2.f32 %v1171_v28  ;;  %v1178_v49 = vmul.f32 -1.442695, %v1518_v47  ;;  %v576_v32 = vstv %s1531_s7 }
  0x20   : > { %v1504_v39 = vadd.f32 %v1443_v2, %v556_v35  ;;  %v1507_v40 = vadd.f32 %v1443_v2, %v557_v36  ;;  %1248 = vpow2.f32 %v1172_v30  ;;  %v1179_v50 = vmul.f32 -1.442695, %v1521_v48 }
  0x21   : > { %1250 = vpow2.f32 %v1173_v34 }
  0x22   : > { %v1176_v41 = vmul.f32 -1.442695, %v1504_v39  ;;  %v1177_v42 = vmul.f32 -1.442695, %v1507_v40  ;;  %1252 = vpow2.f32 %v1174_v37  ;;  %v1572_v37 = vld [vmem:[%s1842_s4 + $0x3] ss:$0 sm:$0xff] }
  0x23   : > { %1254 = vpow2.f32 %v1175_v38 }
  0x24   : > { %1256 = vpow2.f32 %v1176_v41 }
  0x25   : > { %1258 = vpow2.f32 %v1177_v42 }
  0x26   : > { %1260 = vpow2.f32 %v1178_v49  ;;  %v1587_v49 = vld [vmem:[%s1842_s4 + $0x4] ss:$0 sm:$0xff] }
  0x27   : > { %1262 = vpow2.f32 %v1179_v50 }
  0x29   : > { %v1241_v51 = vpop.eup %1240 }
  0x2a   : > { %v1243_v52 = vpop.eup %1242  ;;  %v512_v53 = vadd.f32 1.0, %v1241_v51 }
  0x2b   : > { %v1245_v54 = vpop.eup %1244  ;;  %v513_v55 = vadd.f32 1.0, %v1243_v52 }
  0x2c   : > { %v1247_v56 = vpop.eup %1246  ;;  %1264 = vrcp.f32 %v512_v53  ;;  %v514_v57 = vadd.f32 1.0, %v1245_v54 }
  0x2d   : > { %v1249_v58 = vpop.eup %1248  ;;  %1266 = vrcp.f32 %v513_v55  ;;  %v515_v59 = vadd.f32 1.0, %v1247_v56 }
  0x2e   : > { %v1251_v60 = vpop.eup %1250  ;;  %1268 = vrcp.f32 %v514_v57  ;;  %v516_v61 = vadd.f32 1.0, %v1249_v58  ;;  %v601_v58 = vstv %s1565_s11  ;;  %s1693_s11 = scalar_lea.vmem %s1843_s5, %s1142_s10  ;;  %s438_s10 = sadd.s32 %s1164_s9, %s1865_s21 }
  0x2f   : > { %v1253_v62 = vpop.eup %1252  ;;  %1270 = vrcp.f32 %v515_v59  ;;  %v517_v63 = vadd.f32 1.0, %v1251_v60  ;;  %v1609_v60 = vld [vmem:[%s1842_s4 + $0x6] ss:$0 sm:$0xff]  ;;  %s1165_s12 = sshll.u32 %s438_s10, 1 }
  0x30   : > { %v1255_v0 = vpop.eup %1254  ;;  %1272 = vrcp.f32 %v516_v61  ;;  %v518_v1 = vadd.f32 1.0, %v1253_v62  ;;  %s1804_s16 = scalar_lea.vmem %s1844_s6, %s1165_s12 }
  0x31   : > { %v1257_v2 = vpop.eup %1256  ;;  %1274 = vrcp.f32 %v517_v63  ;;  %v519_v3 = vadd.f32 1.0, %v1255_v0 }
  0x32   : > { %v1259_v4 = vpop.eup %1258  ;;  %v566_v5 = vadd.f32 1.0, %v1257_v2  ;;  %1276 = vrcp.f32 %v518_v1 }
  0x33   : > { %v567_v6 = vadd.f32 1.0, %v1259_v4  ;;  %1278 = vrcp.f32 %v519_v3  ;;  %v1261_v7 = vpop.eup %1260  ;;  %v1619_v3 = vld [vmem:[%s1842_s4 + $0x5] ss:$0 sm:$0xff] }
  0x34   : > { %1280 = vrcp.f32 %v566_v5  ;;  %v1263_v8 = vpop.eup %1262  ;;  %v591_v9 = vadd.f32 1.0, %v1261_v7 }
  0x35   : > { %1282 = vrcp.f32 %v567_v6  ;;  %v592_v11 = vadd.f32 1.0, %v1263_v8 }
  0x36   : > { %1284 = vrcp.f32 %v591_v9 }
  0x37   : > { %1286 = vrcp.f32 %v592_v11 }
  0x39   : > { %v1265_v10 = vpop.eup %1264 }
  0x3a   : > { %v1267_v12 = vpop.eup %1266  ;;  %v536_v13 = vmul.f32 %v1265_v10, %v1457_v17 }
  0x3b   : > { %v1269_v14 = vpop.eup %1268  ;;  %v537_v15 = vmul.f32 %v1267_v12, %v1460_v18 }
  0x3c   : > { %v1271_v16 = vpop.eup %1270  ;;  %546 = vst.msk [vmem:[#allocation2 + $0x28] sm:$0xff] %vm545_vm1, %v536_v13  ;;  %v538_v23 = vmul.f32 %v1269_v14, %v1463_v19 }
  0x3d   : > { %v1273_v24 = vpop.eup %1272  ;;  %547 = vst.msk [vmem:[#allocation2 + $0x30] sm:$0xff] %vm545_vm1, %v537_v15  ;;  %v539_v25 = vmul.f32 %v1271_v16, %v1470_v20  ;;  %v1642_v15 = vld [vmem:[%s1842_s4 + $0x8] ss:$0 sm:$0xff] }
  0x3e   : > { %v1275_v17 = vpop.eup %1274  ;;  %548 = vst.msk [vmem:[#allocation2 + $0x48] sm:$0xff] %vm545_vm1, %v538_v23  ;;  %v540_v26 = vmul.f32 %v1273_v24, %v1473_v21  ;;  %v1547_v21 = vld [vmem:[%s1842_s4] ss:$0 sm:$0xff] }
  0x3f   : > { %v1277_v18 = vpop.eup %1276  ;;  %549 = vst.msk [vmem:[#allocation2 + $0x50] sm:$0xff] %vm545_vm1, %v539_v25  ;;  %v541_v27 = vmul.f32 %v1275_v17, %v1476_v22  ;;  %v1552_v22 = vld [vmem:[%s1842_s4 + $0x1] ss:$0 sm:$0xff] }
  0x40   : > { %v1279_v19 = vpop.eup %1278  ;;  %550 = vst.msk [vmem:[#allocation2 + $0x68] sm:$0xff] %vm545_vm1, %v540_v26  ;;  %v542_v28 = vmul.f32 %v1277_v18, %v1486_v29  ;;  %v1559_v29 = vld [vmem:[%s1842_s4 + $0x2] ss:$0 sm:$0xff] }
  0x41   : > { %v1281_v30 = vpop.eup %1280  ;;  %551 = vst.msk [vmem:[#allocation2 + $0x70] sm:$0xff] %vm545_vm1, %v541_v27  ;;  %v543_v20 = vmul.f32 %v1279_v19, %v1493_v31 }
  0x42   : > { %v1283_v33 = vpop.eup %1282  ;;  %v572_v34 = vmul.f32 %v1281_v30, %v1504_v39  ;;  %552 = vst.msk [vmem:[#allocation2 + $0x88] sm:$0xff] %vm545_vm1, %v542_v28 }
  0x43   : > { %v573_v31 = vmul.f32 %v1283_v33, %v1507_v40  ;;  %553 = vst.msk [vmem:[#allocation2 + $0x90] sm:$0xff] %vm545_vm1, %v543_v20  ;;  %v612_v35 = vld [vmem:[#allocation2 + $0x27] sm:$0xff]  ;;  %v1285_v57 = vpop.eup %1284 }
  0x44   : > { %v1567_v36 = vld [vmem:[#allocation2 + $0x28] sm:$0xff]  ;;  %v577_v38 = vmul.f32 %v576_v32, %v572_v34  ;;  %v624_v39 = vmul.f32 %v1547_v21, %v612_v35  ;;  %v1579_v43 = vld [vmem:[#allocation2 + $0x30] sm:$0xff]  ;;  %v1287_v63 = vpop.eup %1286  ;;  %v597_v0 = vmul.f32 %v1285_v57, %v1518_v47  ;;  %v1629_v47 = vld [vmem:[%s1842_s4 + $0x7] ss:$0 sm:$0xff]  ;;  %v709_v10 = vmul.f32 %v1572_v37, %v612_v35 }
  0x45   : > { %v653_v41 = vmul.f32 %v1552_v22, %v1567_v36  ;;  %v670_v40 = vld [vmem:[#allocation2 + $0x29] sm:$0xff]  ;;  %v578_v44 = vmul.f32 %v576_v32, %v573_v31  ;;  %v654_v51 = vmul.f32 %v1552_v22, %v1579_v43  ;;  %v1593_v52 = vld [vmem:[#allocation2 + $0x31] sm:$0xff]  ;;  %v598_v5 = vmul.f32 %v1287_v63, %v1521_v48 }
  0x46   : > { %v1577_v42 = vld [vmem:[#allocation2 + $0x2f] sm:$0xff]  ;;  %v682_v45 = vmul.f32 %v1559_v29, %v670_v40  ;;  %v1582_v46 = vld [vmem:[#allocation2 + $0x47] sm:$0xff]  ;;  %604 = vst.msk [vmem:[#allocation2 + $0x8] sm:$0xff] %vm545_vm1, %v577_v38  ;;  %v683_v55 = vmul.f32 %v1559_v29, %v1593_v52  ;;  %v602_v11 = vmul.f32 %v601_v58, %v597_v0  ;;  %v738_v38 = vmul.f32 %v1587_v49, %v1567_v36 }
  0x47   : > { %v625_v50 = vmul.f32 %v1547_v21, %v1577_v42  ;;  %v661_v53 = vadd.f32 %v653_v41, %v624_v39  ;;  %v711_v54 = vmul.f32 %v1572_v37, %v1582_v46  ;;  %v1600_v56 = vld [vmem:[#allocation2 + $0x4f] sm:$0xff]  ;;  %605 = vst.msk [vmem:[#allocation2 + $0x10] sm:$0xff] %vm545_vm1, %v578_v44  ;;  %v1624_v7 = vld [vmem:[#allocation2 + $0x67] sm:$0xff]  ;;  %v603_v23 = vmul.f32 %v601_v58, %v598_v5 }
  0x48   : > { %v1604_v59 = vld [vmem:[#allocation2 + $0x48] sm:$0xff]  ;;  %v712_v62 = vmul.f32 %v1572_v37, %v1600_v56  ;;  %v1621_v4 = vld [vmem:[#allocation2 + $0x50] sm:$0xff]  ;;  %v799_v48 = vmul.f32 %v1609_v60, %v1624_v7  ;;  %607 = vst.msk [vmem:[#allocation2 + $0xa8] sm:$0xff] %vm545_vm1, %v602_v11  ;;  %v767_v39 = vmul.f32 %v1619_v3, %v670_v40 }
  0x49   : > { %v662_v61 = vadd.f32 %v654_v51, %v625_v50  ;;  %v690_v1 = vadd.f32 %v682_v45, %v661_v53  ;;  %v740_v2 = vmul.f32 %v1587_v49, %v1604_v59  ;;  %v757_v6 = vld [vmem:[#allocation2 + $0x49] sm:$0xff]  ;;  %v741_v9 = vmul.f32 %v1587_v49, %v1621_v4  ;;  %v1644_v16 = vld [vmem:[#allocation2 + $0x51] sm:$0xff]  ;;  %608 = vst.msk [vmem:[#allocation2 + $0xb0] sm:$0xff] %vm545_vm1, %v603_v23 }
  0x4a   : > { %v769_v13 = vmul.f32 %v1619_v3, %v757_v6  ;;  %v1637_v14 = vld [vmem:[#allocation2 + $0x68] sm:$0xff]  ;;  %v770_v26 = vmul.f32 %v1619_v3, %v1644_v16  ;;  %v1654_v27 = vld [vmem:[#allocation2 + $0x70] sm:$0xff]  ;;  %v797_v51 = vmul.f32 %v1609_v60, %v1582_v46  ;;  %v826_v57 = vmul.f32 %v1629_v47, %v1604_v59 }
  0x4b   : > { %v691_v8 = vadd.f32 %v683_v55, %v662_v61  ;;  %v719_v12 = vadd.f32 %v711_v54, %v690_v1  ;;  %v828_v24 = vmul.f32 %v1629_v47, %v1637_v14  ;;  %v1648_v25 = vld [vmem:[#allocation2 + $0x69] sm:$0xff]  ;;  %v829_v32 = vmul.f32 %v1629_v47, %v1654_v27  ;;  %v1663_v20 = vld [vmem:[#allocation2 + $0x71] sm:$0xff] }
  0x4c   : > { %v1652_v18 = vld [vmem:[#allocation2 + $0x6f] sm:$0xff]  ;;  %v857_v28 = vmul.f32 %v1642_v15, %v1648_v25  ;;  %v858_v34 = vmul.f32 %v1642_v15, %v1663_v20  ;;  %v855_v0 = vmul.f32 %v1642_v15, %v757_v6 }
  0x4d   : > { %v720_v17 = vadd.f32 %v712_v62, %v691_v8  ;;  %v748_v19 = vadd.f32 %v740_v2, %v719_v12  ;;  %v800_v30 = vmul.f32 %v1609_v60, %v1652_v18  ;;  %v610_v31 = vld [vmem:[#allocation2 + $0x7] sm:$0xff]  ;;  %v710_v8 = vmul.f32 %v1572_v37, %v1577_v42 }
  0x4e   : > { %v639_v35 = vld [vmem:[#allocation2 + $0x8] sm:$0xff]  ;;  %v622_v44 = vmul.f32 %v1547_v21, %v610_v31  ;;  %v640_v54 = vld [vmem:[#allocation2 + $0x10] sm:$0xff]  ;;  %v626_v12 = vmul.f32 %v1547_v21, %v1582_v46  ;;  %v739_v42 = vmul.f32 %v1587_v49, %v1579_v43 }
  0x4f   : > { %v749_v33 = vadd.f32 %v741_v9, %v720_v17  ;;  %v777_v41 = vadd.f32 %v769_v13, %v748_v19  ;;  %v651_v45 = vmul.f32 %v1552_v22, %v639_v35  ;;  %v668_v50 = vld [vmem:[#allocation2 + $0x9] sm:$0xff]  ;;  %v652_v40 = vmul.f32 %v1552_v22, %v640_v54  ;;  %v669_v58 = vld [vmem:[#allocation2 + $0x11] sm:$0xff] }
  0x50   : > { %v611_v53 = vld [vmem:[#allocation2 + $0xf] sm:$0xff]  ;;  %v680_v63 = vmul.f32 %v1559_v29, %v668_v50  ;;  %v681_v5 = vmul.f32 %v1559_v29, %v669_v58  ;;  %v655_v13 = vmul.f32 %v1552_v22, %v1604_v59  ;;  %v713_v59 = vmul.f32 %v1572_v37, %v1624_v7 }
  0x51   : > { %v778_v55 = vadd.f32 %v770_v26, %v749_v33  ;;  %v623_v36 = vmul.f32 %v1547_v21, %v611_v53  ;;  %v807_v61 = vadd.f32 %v799_v48, %v777_v41  ;;  %v659_v62 = vadd.f32 %v651_v45, %v622_v44  ;;  %v818_v31 = vld [vmem:[#allocation2 + $0x88] sm:$0xff] }
  0x52   : > { %v663_v26 = vadd.f32 %v655_v13, %v626_v12  ;;  %v798_v33 = vmul.f32 %v1609_v60, %v1600_v56  ;;  %v856_v35 = vmul.f32 %v1642_v15, %v1644_v16  ;;  %v771_v41 = vmul.f32 %v1619_v3, %v1648_v25  ;;  %v847_v50 = vld [vmem:[#allocation2 + $0x89] sm:$0xff] }
  0x53   : > { %v808_v1 = vadd.f32 %v800_v30, %v778_v55  ;;  %v660_v2 = vadd.f32 %v652_v40, %v623_v36  ;;  %v836_v9 = vadd.f32 %v828_v24, %v807_v61  ;;  %v688_v11 = vadd.f32 %v680_v63, %v659_v62 }
  0x54   : > { %v684_v24 = vmul.f32 %v1559_v29, %v757_v6  ;;  %v827_v6 = vmul.f32 %v1629_v47, %v1621_v4  ;;  %v656_v53 = vmul.f32 %v1552_v22, %v1621_v4  ;;  %v685_v54 = vmul.f32 %v1559_v29, %v1644_v16 }
  0x55   : > { %v837_v48 = vadd.f32 %v829_v32, %v808_v1  ;;  %v689_v23 = vadd.f32 %v681_v5, %v660_v2  ;;  %v1698_v17 = vadd.f32 %v857_v28, %v836_v9  ;;  %v717_v46 = vadd.f32 %v709_v10, %v688_v11  ;;  %v790_v9 = vld [vmem:[#allocation2 + $0x8f] sm:$0xff] }
  0x56   : > { %v768_v32 = vmul.f32 %v1619_v3, %v1593_v52  ;;  %v692_v10 = vadd.f32 %v684_v24, %v663_v26  ;;  %v742_v28 = vmul.f32 %v1587_v49, %v1637_v14  ;;  %v830_v58 = vmul.f32 %v1629_v47, %v818_v31 }
  0x57   : > { %v1702_v19 = vadd.f32 %v858_v34, %v837_v48  ;;  %v718_v30 = vadd.f32 %v710_v8, %v689_v23  ;;  %873 = vst.msk [vmem:[%s1693_s11 + $0x10] sm:$0xff] %vm545_vm1, %v1698_v17  ;;  %v746_v43 = vadd.f32 %v738_v38, %v717_v46  ;;  %v789_v34 = vld [vmem:[#allocation2 + $0x87] sm:$0xff]  ;;  %v627_v38 = vmul.f32 %v1547_v21, %v1600_v56 }
  0x58   : > { %v721_v45 = vadd.f32 %v713_v59, %v692_v10  ;;  %v882_v55 = vsel %vm545_vm1, %v1698_v17, 0.0  ;;  %v801_v40 = vmul.f32 %v1609_v60, %v789_v34  ;;  %v859_v4 = vmul.f32 %v1642_v15, %v847_v50  ;;  %v791_v10 = vld [vmem:[#allocation2 + $0xa7] sm:$0xff] }
  0x59   : > { %874 = vst.msk [vmem:[%s1693_s11 + $0x18] sm:$0xff] %vm545_vm1, %v1702_v19  ;;  %v747_v52 = vadd.f32 %v739_v42, %v718_v30  ;;  %v775_v44 = vadd.f32 %v767_v39, %v746_v43  ;;  %v664_v56 = vadd.f32 %v656_v53, %v627_v38  ;;  %v714_v39 = vmul.f32 %v1572_v37, %v1652_v18 }
  0x5a   : > { %v750_v62 = vadd.f32 %v742_v28, %v721_v45  ;;  %v743_v16 = vmul.f32 %v1587_v49, %v1654_v27  ;;  %v628_v1 = vmul.f32 %v1547_v21, %v1624_v7  ;;  %v657_v11 = vmul.f32 %v1552_v22, %v1637_v14 }
  0x5b   : > { %v776_v36 = vadd.f32 %v768_v32, %v747_v52  ;;  %v805_v61 = vadd.f32 %v797_v51, %v775_v44  ;;  %v693_v8 = vadd.f32 %v685_v54, %v664_v56  ;;  %v819_v51 = vld [vmem:[#allocation2 + $0x90] sm:$0xff]  ;;  %v772_v13 = vmul.f32 %v1619_v3, %v1663_v20  ;;  %v820_v44 = vld [vmem:[#allocation2 + $0xa8] sm:$0xff] }
  0x5c   : > { %v779_v5 = vadd.f32 %v771_v41, %v750_v62  ;;  %v686_v48 = vmul.f32 %v1559_v29, %v1648_v25  ;;  %v715_v23 = vmul.f32 %v1572_v37, %v789_v34  ;;  %v665_v24 = vadd.f32 %v657_v11, %v628_v1  ;;  %v848_v32 = vld [vmem:[#allocation2 + $0x91] sm:$0xff] }
  0x5d   : > { %v806_v63 = vadd.f32 %v798_v33, %v776_v36  ;;  %v834_v2 = vadd.f32 %v826_v57, %v805_v61  ;;  %v722_v42 = vadd.f32 %v714_v39, %v693_v8  ;;  %v802_v26 = vmul.f32 %v1609_v60, %v790_v9  ;;  %v849_v36 = vld [vmem:[#allocation2 + $0xa9] sm:$0xff] }
  0x5e   : > { %v809_v57 = vadd.f32 %v801_v40, %v779_v5  ;;  %v831_v14 = vmul.f32 %v1629_v47, %v819_v51  ;;  %v744_v59 = vmul.f32 %v1587_v49, %v818_v31  ;;  %v694_v33 = vadd.f32 %v686_v48, %v665_v24 }
  0x5f   : > { %v835_v12 = vadd.f32 %v827_v6, %v806_v63  ;;  %v1746_v7 = vadd.f32 %v855_v0, %v834_v2  ;;  %v751_v0 = vadd.f32 %v743_v16, %v722_v42  ;;  %v773_v6 = vmul.f32 %v1619_v3, %v847_v50 }
  0x60   : > { %v838_v30 = vadd.f32 %v830_v58, %v809_v57  ;;  %v629_v28 = vmul.f32 %v1547_v21, %v1652_v18  ;;  %v658_v34 = vmul.f32 %v1552_v22, %v1654_v27  ;;  %v723_v41 = vadd.f32 %v715_v23, %v694_v33 }
  0x61   : > { %v1748_v46 = vadd.f32 %v856_v35, %v835_v12  ;;  %871 = vst.msk [vmem:[%s1693_s11] sm:$0xff] %vm545_vm1, %v1746_v7  ;;  %v879_v25 = vsel %vm545_vm1, %v1746_v7, 0.0  ;;  %v780_v35 = vadd.f32 %v772_v13, %v751_v0  ;;  %v860_v38 = vmul.f32 %v1642_v15, %v848_v32 }
  0x62   : > { %v1768_v52 = vadd.f32 %v859_v4, %v838_v30  ;;  %v666_v45 = vadd.f32 %v658_v34, %v629_v28  ;;  %v687_v53 = vmul.f32 %v1559_v29, %v1663_v20  ;;  %v716_v50 = vmul.f32 %v1572_v37, %v790_v9  ;;  %v850_v9 = vld [vmem:[#allocation2 + $0xb1] sm:$0xff] }
  0x63   : > { %872 = vst.msk [vmem:[%s1693_s11 + $0x8] sm:$0xff] %vm545_vm1, %v1748_v46  ;;  %v880_v43 = vsel %vm545_vm1, %v1748_v46, 0.0  ;;  %v810_v21 = vadd.f32 %v802_v26, %v780_v35  ;;  %v752_v22 = vadd.f32 %v744_v59, %v723_v41  ;;  %v803_v18 = vmul.f32 %v1609_v60, %v791_v10 }
  0x64   : > { %v881_v31 = vadd.f32 %v880_v43, %v879_v25  ;;  %875 = vst.msk [vmem:[%s1693_s11 + $0x20] sm:$0xff] %vm545_vm1, %v1768_v52  ;;  %v884_v27 = vsel %vm545_vm1, %v1702_v19, 0.0  ;;  %v695_v40 = vadd.f32 %v687_v53, %v666_v45  ;;  %v745_v58 = vmul.f32 %v1587_v49, %v819_v51  ;;  %v821_v49 = vld [vmem:[#allocation2 + $0xb0] sm:$0xff] }
  0x65   : > { %v839_v29 = vadd.f32 %v831_v14, %v810_v21  ;;  %v781_v20 = vadd.f32 %v773_v6, %v752_v22  ;;  %v832_v37 = vmul.f32 %v1629_v47, %v820_v44  ;;  %v886_v62 = vsel %vm545_vm1, %v1768_v52, 0.0 }
  0x66   : > { %v883_v54 = vadd.f32 %v882_v55, %v881_v31  ;;  %v792_v55 = vld [vmem:[#allocation2 + $0xaf] sm:$0xff]  ;;  %v724_v56 = vadd.f32 %v716_v50, %v695_v40  ;;  %v774_v39 = vmul.f32 %v1619_v3, %v848_v32  ;;  %v861_v1 = vmul.f32 %v1642_v15, %v849_v36 }
  0x67   : > { %v868_v4 = vadd.f32 %v860_v38, %v839_v29  ;;  %v811_v16 = vadd.f32 %v803_v18, %v781_v20  ;;  %v804_v5 = vmul.f32 %v1609_v60, %v792_v55  ;;  %v833_v3 = vmul.f32 %v1629_v47, %v821_v49 }
  0x68   : > { %v885_v61 = vadd.f32 %v884_v27, %v883_v54  ;;  %v753_v2 = vadd.f32 %v745_v58, %v724_v56  ;;  %v862_v23 = vmul.f32 %v1642_v15, %v850_v9 }
  0x69   : > { %876 = vst.msk [vmem:[%s1693_s11 + $0x28] sm:$0xff] %vm545_vm1, %v868_v4  ;;  %v840_v8 = vadd.f32 %v832_v37, %v811_v16  ;;  %v888_v51 = vsel %vm545_vm1, %v868_v4, 0.0 }
  0x6a   : > { %v887_v63 = vadd.f32 %v886_v62, %v885_v61  ;;  %v782_v11 = vadd.f32 %v774_v39, %v753_v2 }
  0x6b   : > { %v869_v13 = vadd.f32 %v861_v1, %v840_v8 }
  0x6c   : > { %v889_v12 = vadd.f32 %v888_v51, %v887_v63  ;;  %v812_v48 = vadd.f32 %v804_v5, %v782_v11 }
  0x6d   : > { %877 = vst.msk [vmem:[%s1693_s11 + $0x30] sm:$0xff] %vm545_vm1, %v869_v13  ;;  %v890_v60 = vsel %vm545_vm1, %v869_v13, 0.0 }
  0x6e   : > { %v841_v57 = vadd.f32 %v833_v3, %v812_v48  ;;  %v891_v42 = vadd.f32 %v890_v60, %v889_v12 }
  0x70   : > { %v870_v24 = vadd.f32 %v862_v23, %v841_v57 }
  0x72   : > { %878 = vst.msk [vmem:[%s1693_s11 + $0x38] sm:$0xff] %vm545_vm1, %v870_v24  ;;  %v892_v26 = vsel %vm545_vm1, %v870_v24, 0.0 }
  0x73   : > { %v893_v14 = vadd.f32 %v892_v26, %v891_v42 }
  0x75   : > { %v894_v47 = vrot.slane %v893_v14, 4 }
  0x77   : > { %v895_v59 = vadd.f32 %v894_v47, %v893_v14 }
  0x79   : > { %v896_v25 = vrot.slane %v895_v59, 2 }
  0x7b   : > { %v897_v15 = vadd.f32 %v896_v25, %v895_v59 }
  0x7d   : > { %v898_v30 = vrot.slane %v897_v15, 1 }
  0x7f   : > { %v899_v0 = vadd.f32 %v898_v30, %v897_v15 }
  0x81   : > { %v900_v32 = vmul.f32 0.015625, %v899_v0 }
  0x83   : > { %909 = vst.msk [vmem:[%s1804_s16] sm:$0x1] %vm443_vm0, %v900_v32  ;;  %v901_v33 = vsub.f32 %v1746_v7, %v900_v32  ;;  %v902_v43 = vsub.f32 %v1748_v46, %v900_v32  ;;  %v903_v6 = vsub.f32 %v1698_v17, %v900_v32  ;;  %v904_v10 = vsub.f32 %v1702_v19, %v900_v32 }
  0x84   : > { %v905_v28 = vsub.f32 %v1768_v52, %v900_v32  ;;  %v906_v41 = vsub.f32 %v868_v4, %v900_v32  ;;  %v907_v50 = vsub.f32 %v869_v13, %v900_v32  ;;  %v908_v17 = vsub.f32 %v870_v24, %v900_v32 }
  0x85   : > { %v910_v34 = vmul.f32 %v901_v33, %v901_v33  ;;  %v911_v31 = vmul.f32 %v902_v43, %v902_v43  ;;  %v912_v35 = vmul.f32 %v903_v6, %v903_v6  ;;  %v913_v38 = vmul.f32 %v904_v10, %v904_v10 }
  0x86   : > { %v914_v7 = vmul.f32 %v905_v28, %v905_v28  ;;  %v915_v21 = vmul.f32 %v906_v41, %v906_v41  ;;  %v916_v22 = vmul.f32 %v907_v50, %v907_v50  ;;  %v917_v36 = vmul.f32 %v908_v17, %v908_v17 }
  0x87   : > { %v918_v44 = vsel %vm545_vm1, %v910_v34, 0.0  ;;  %v919_v45 = vsel %vm545_vm1, %v911_v31, 0.0  ;;  %v921_v46 = vsel %vm545_vm1, %v912_v35, 0.0  ;;  %v923_v19 = vsel %vm545_vm1, %v913_v38, 0.0 }
  0x88   : > { %v920_v53 = vadd.f32 %v919_v45, %v918_v44  ;;  %v925_v18 = vsel %vm545_vm1, %v914_v7, 0.0  ;;  %v927_v40 = vsel %vm545_vm1, %v915_v21, 0.0  ;;  %v929_v61 = vsel %vm545_vm1, %v916_v22, 0.0 }
  0x89   : > { %v931_v20 = vsel %vm545_vm1, %v917_v36, 0.0 }
  0x8a   : > { %v922_v54 = vadd.f32 %v921_v46, %v920_v53 }
  0x8c   : > { %v924_v52 = vadd.f32 %v923_v19, %v922_v54 }
  0x8e   : > { %v926_v27 = vadd.f32 %v925_v18, %v924_v52 }
  0x90   : > { %v928_v58 = vadd.f32 %v927_v40, %v926_v27 }
  0x92   : > { %v930_v29 = vadd.f32 %v929_v61, %v928_v58 }
  0x94   : > { %v932_v37 = vadd.f32 %v931_v20, %v930_v29 }
  0x96   : > { %v933_v55 = vrot.slane %v932_v37, 4 }
  0x98   : > { %v934_v62 = vadd.f32 %v933_v55, %v932_v37 }
  0x9a   : > { %v935_v56 = vrot.slane %v934_v62, 2 }
  0x9c   : > { %v936_v39 = vadd.f32 %v935_v56, %v934_v62 }
  0x9e   : > { %v937_v63 = vrot.slane %v936_v39, 1 }
  0xa0   : > { %v938_v4 = vadd.f32 %v937_v63, %v936_v39 }
  0xa2   : > { %939 = vst.msk [vmem:[%s1804_s16 + $0x1] sm:$0x1] %vm443_vm0, %v938_v4 }
  0xa3 PF: > { %s17_s25 = sadd.s32 1, %s1326_s25   ;;  %s1846_s21 = smov %s1318_s23 }
  0xa4   : > { %p14_p13 = scmp.ge.s32.totalorder %s17_s25, 10   ;;  %s1847_s22 = smov %s1322_s24 }
  0xa5   : > { %s1848_s23 = smov %s1851_s26  ;;  %s1849_s24 = smov %s1855_s27 }
  0xa6   :  { %16 = sbr.rel (!%p14_p13) target bundleno = 3 (0x3), region = 91 }

// kernel: mbconv_forward.7
= control target key start
LH: loop header
LB: loop body
LE: loop exit
PB: predicated region body
PF: predicated region fallthrough
CT: control target
= control target key end

     0   :  { %s1235_s18 = smov 0   ;;  %s1237_s19 = smov 0   ;;  %s1620_s0 = inlined_call_operand.vmem [shape: f32[2,256,16], index: 0, kind: input, shape index: {}]   ;;  %s1621_s1 = inlined_call_operand.vmem [shape: f32[2,16], index: 1, kind: input, shape index: {}]   ;;  %s1622_s2 = inlined_call_operand.vmem [shape: f32[2,1,16], index: 2, kind: input, shape index: {}]   ;;  %s1623_s3 = inlined_call_operand.vmem [shape: f32[16,4], index: 3, kind: input, shape index: {}]   ;;  %s1624_s4 = inlined_call_operand.vmem [shape: f32[2,256,4], index: 4, kind: output, shape index: {0}]   ;;  %s1625_s5 = inlined_call_operand.vmem [shape: f32[2,2,2,4], index: 5, kind: output, shape index: {1}]  }
   0x1   :  { %s1239_s20 = smov 0   ;;  %s1241_s21 = smov 0  }
   0x2   :  { %s1243_s22 = smov 0  }
   0x3 LB: > { %s25_s23 = sadd.s32 1, %s1195_s20  ;;  %s28_s24 = sadd.s32 1, %s1199_s21  ;;  %s1203_s22 = sphi %s1243_s22, %s16_s22   ;;  %s1199_s21 = sphi %s1241_s21, %s1629_s21   ;;  %s1195_s20 = sphi %s1239_s20, %s1628_s20   ;;  %s1191_s19 = sphi %s1237_s19, %s1627_s19   ;;  %s1187_s18 = sphi %s1235_s18, %s1626_s18  }
   0x4   : > { %p26_p0 = scmp.ge.s32.totalorder %s25_s23, 2  ;;  %p965_p1 = scmp.ge.s32.totalorder %s1203_s22, 1 }
   0x5   : > { %p221_p2 = scmp.lt.s32.totalorder %s1203_s22, 5 }
   0x6   : > { %s1631_s23 = smov (%p26_p0, %s25_s23), 0  ;;  %s1633_s24 = smov (!%p26_p0, %s28_s24), %s1199_s21 }
   0x7   : > { %p222_p3 = pnand %p965_p1, %p221_p2  ;;  %p30_p4 = scmp.ge.s32.totalorder %s1633_s24, 2 }
   0x8   : > { %s966_s29 = sshll.u32 (!%p222_p3), %s1187_s18, 4  ;;  %p269_p5 = scmp.lt.s32.totalorder (!%p222_p3), %s1191_s19, 1 }
   0x9   : > { %s1635_s24 = smov (%p30_p4, %s1633_s24), 0  ;;  %225 = sbr.rel (%p222_p3) target bundleno = 351 (0x15f), region = 36 }
   0xa   : > { %p271_p6 = scmp.lt.s32.totalorder (!%p222_p3), %s966_s29, 31  ;;  %p293_p7 = scmp.lt.s32.totalorder (!%p222_p3), %s1187_s18, 1 }
   0xe   : > { %v493_v0 = vld [vmem:[%s1623_s3 + $0x8] sm:$0xff]  ;;  %v492_v1 = vld [vmem:[%s1623_s3] sm:$0xff]  ;;  %s1637_s19 = smov (!%p269_p5, %s1191_s19), 1  ;;  %s1639_s29 = smov (!%p271_p6, %s966_s29), 31  ;;  %vm494_vm0 = vcmask 130048   ;;  %vm688_vm1 = vcmask 31744  }
   0xf   : > { %1029 = vmatprep.subr.mxu0 %v493_v0  ;;  %1057 = vmatprep.subr.mxu1 %v493_v0  ;;  %s967_s30 = sshll.u32 %s1637_s19, 5  ;;  %v1283_v2 = vld [vmem:[%s1621_s1] ss:$0 sm:$0xff]  ;;  %v1295_v3 = vld [vmem:[%s1621_s1 + $0x1] ss:$0 sm:$0xff]  ;;  %s280_s17 = scalar_lea.vmem %s1622_s2, %s1637_s19  ;;  %vm759_vm2 = vcmask 24576  }
  0x10   : > { %1030 = vmatpush3.msra.mxu0 %v493_v0  ;;  %1059 = vmatpush3.msra.mxu1 %v493_v0  ;;  %s1277_s6 = sadd.s32 %s967_s30, %s1639_s29  ;;  %s1641_s18 = smov (!%p293_p7, %s1187_s18), 1 }
  0x11   : > { %1031 = vmatprep.subr.mxu0 %v492_v1  ;;  %1058 = vmatprep.subr.mxu1 %v492_v1  ;;  %s968_s7 = sshll.u32 %s1277_s6, 3  ;;  %s972_s28 = sshll.u32 %s1637_s19, 1 }
  0x12   : > { %1032 = vmatpush3.msra.mxu0 %v492_v1  ;;  %1060 = vmatpush3.msra.mxu1 %v492_v1  ;;  %s1290_s12 = scalar_lea.vmem %s1620_s0, %s968_s7  ;;  %s1452_s27 = scalar_lea.vmem %s1624_s4, %s968_s7 }
  0x13   : > { %v301_v4 = vld [vmem:[%s1290_s12] sm:$0xff]  ;;  %v302_v5 = vld [vmem:[%s1290_s12 + $0x8] sm:$0xff]  ;;  %v303_v6 = vld [vmem:[%s1290_s12 + $0x10] sm:$0xff]  ;;  %s296_s29 = sadd.s32 %s972_s28, %s1641_s18 }
  0x14   : > { %v321_v7 = vmul.f32 %v1283_v2, %v301_v4  ;;  %v322_v8 = vmul.f32 %v1283_v2, %v302_v5  ;;  %v323_v9 = vmul.f32 %v1283_v2, %v303_v6  ;;  %v304_v10 = vld [vmem:[%s1290_s12 + $0x18] sm:$0xff]  ;;  %v305_v11 = vld [vmem:[%s1290_s12 + $0x20] sm:$0xff]  ;;  %v306_v12 = vld [vmem:[%s1290_s12 + $0x28] sm:$0xff]  ;;  %s973_s30 = sshll.u32 %s296_s29, 1 }
  0x15   : > { %v324_v13 = vmul.f32 %v1283_v2, %v304_v10  ;;  %v325_v14 = vmul.f32 %v1283_v2, %v305_v11  ;;  %v326_v15 = vmul.f32 %v1283_v2, %v306_v12  ;;  %v307_v16 = vld [vmem:[%s1290_s12 + $0x30] sm:$0xff]  ;;  %v308_v17 = vld [vmem:[%s1290_s12 + $0x38] sm:$0xff]  ;;  %v309_v22 = vld [vmem:[%s1290_s12 + $0x40] sm:$0xff]  ;;  %s1568_s8 = scalar_lea.vmem %s1625_s5, %s973_s30 }
  0x16   : > { %v1312_v18 = vadd.f32 %v1295_v3, %v321_v7  ;;  %v1315_v19 = vadd.f32 %v1295_v3, %v322_v8  ;;  %v1318_v20 = vadd.f32 %v1295_v3, %v323_v9  ;;  %v327_v21 = vmul.f32 %v1283_v2, %v307_v16  ;;  %v310_v23 = vld [vmem:[%s1290_s12 + $0x48] sm:$0xff]  ;;  %v311_v28 = vld [vmem:[%s1290_s12 + $0x50] sm:$0xff]  ;;  %v312_v29 = vld [vmem:[%s1290_s12 + $0x58] sm:$0xff] }
  0x17   : > { %v1324_v24 = vadd.f32 %v1295_v3, %v324_v13  ;;  %v1327_v25 = vadd.f32 %v1295_v3, %v325_v14  ;;  %v1330_v26 = vadd.f32 %v1295_v3, %v326_v15  ;;  %v328_v27 = vmul.f32 %v1283_v2, %v308_v17  ;;  %v313_v30 = vld [vmem:[%s1290_s12 + $0x60] sm:$0xff]  ;;  %v314_v42 = vld [vmem:[%s1290_s12 + $0x68] sm:$0xff]  ;;  %v315_v52 = vld [vmem:[%s1290_s12 + $0x70] sm:$0xff] }
  0x18   : > { %v976_v31 = vmul.f32 -1.442695, %v1312_v18  ;;  %v977_v32 = vmul.f32 -1.442695, %v1315_v19  ;;  %v978_v33 = vmul.f32 -1.442695, %v1318_v20  ;;  %v1340_v34 = vadd.f32 %v1295_v3, %v327_v21 }
  0x19   : > { %v979_v35 = vmul.f32 -1.442695, %v1324_v24  ;;  %v980_v36 = vmul.f32 -1.442695, %v1327_v25  ;;  %v981_v37 = vmul.f32 -1.442695, %v1330_v26  ;;  %v1346_v38 = vadd.f32 %v1295_v3, %v328_v27 }
  0x1a   : > { %1101 = vpow2.f32 %v976_v31  ;;  %v982_v39 = vmul.f32 -1.442695, %v1340_v34  ;;  %v329_v40 = vmul.f32 %v1283_v2, %v309_v22  ;;  %v330_v41 = vmul.f32 %v1283_v2, %v310_v23  ;;  %v316_v53 = vld [vmem:[%s1290_s12 + $0x78] sm:$0xff] }
  0x1b   : > { %1103 = vpow2.f32 %v977_v32  ;;  %v983_v43 = vmul.f32 -1.442695, %v1346_v38  ;;  %v331_v44 = vmul.f32 %v1283_v2, %v311_v28  ;;  %v332_v45 = vmul.f32 %v1283_v2, %v312_v29 }
  0x1c   : > { %1105 = vpow2.f32 %v978_v33  ;;  %v1356_v46 = vadd.f32 %v1295_v3, %v329_v40  ;;  %v1359_v47 = vadd.f32 %v1295_v3, %v330_v41  ;;  %v333_v48 = vmul.f32 %v1283_v2, %v313_v30 }
  0x1d   : > { %1107 = vpow2.f32 %v979_v35  ;;  %v1363_v49 = vadd.f32 %v1295_v3, %v331_v44  ;;  %v1366_v50 = vadd.f32 %v1295_v3, %v332_v45  ;;  %v334_v51 = vmul.f32 %v1283_v2, %v314_v42  ;;  %v1397_v44 = vld [vmem:[%s280_s17] ss:$0 sm:$0xff] }
  0x1e   : > { %1109 = vpow2.f32 %v980_v36  ;;  %v984_v54 = vmul.f32 -1.442695, %v1356_v46  ;;  %v1373_v55 = vadd.f32 %v1295_v3, %v333_v48  ;;  %v985_v56 = vmul.f32 -1.442695, %v1359_v47 }
  0x1f   : > { %1111 = vpow2.f32 %v981_v37  ;;  %v1377_v57 = vadd.f32 %v1295_v3, %v334_v51  ;;  %v986_v58 = vmul.f32 -1.442695, %v1363_v49  ;;  %v335_v59 = vmul.f32 %v1283_v2, %v315_v52 }
  0x20   : > { %1113 = vpow2.f32 %v982_v39  ;;  %v336_v60 = vmul.f32 %v1283_v2, %v316_v53  ;;  %v987_v61 = vmul.f32 -1.442695, %v1366_v50  ;;  %v988_v62 = vmul.f32 -1.442695, %v1373_v55 }
  0x21   : > { %1115 = vpow2.f32 %v983_v43  ;;  %v1385_v63 = vadd.f32 %v1295_v3, %v335_v59  ;;  %v989_v1 = vmul.f32 -1.442695, %v1377_v57 }
  0x22   : > { %1117 = vpow2.f32 %v984_v54  ;;  %v1388_v0 = vadd.f32 %v1295_v3, %v336_v60 }
  0x23   : > { %1119 = vpow2.f32 %v985_v56  ;;  %v990_v4 = vmul.f32 -1.442695, %v1385_v63 }
  0x24   : > { %1121 = vpow2.f32 %v986_v58  ;;  %v991_v2 = vmul.f32 -1.442695, %v1388_v0 }
  0x25   : > { %1123 = vpow2.f32 %v987_v61 }
  0x26   : > { %1125 = vpow2.f32 %v988_v62 }
  0x27   : > { %v1102_v5 = vpop.eup %1101  ;;  %1127 = vpow2.f32 %v989_v1 }
  0x28   : > { %v1104_v6 = vpop.eup %1103  ;;  %v405_v7 = vadd.f32 1.0, %v1102_v5  ;;  %1129 = vpow2.f32 %v990_v4 }
  0x29   : > { %v1106_v8 = vpop.eup %1105  ;;  %v406_v9 = vadd.f32 1.0, %v1104_v6  ;;  %1131 = vpow2.f32 %v991_v2 }
  0x2a   : > { %v1108_v3 = vpop.eup %1107  ;;  %1133 = vrcp.f32 %v405_v7  ;;  %v407_v10 = vadd.f32 1.0, %v1106_v8 }
  0x2b   : > { %v1110_v11 = vpop.eup %1109  ;;  %1135 = vrcp.f32 %v406_v9  ;;  %v408_v12 = vadd.f32 1.0, %v1108_v3 }
  0x2c   : > { %v1112_v13 = vpop.eup %1111  ;;  %1137 = vrcp.f32 %v407_v10  ;;  %v409_v14 = vadd.f32 1.0, %v1110_v11 }
  0x2d   : > { %v1114_v15 = vpop.eup %1113  ;;  %1139 = vrcp.f32 %v408_v12  ;;  %v410_v16 = vadd.f32 1.0, %v1112_v13 }
  0x2e   : > { %v1116_v17 = vpop.eup %1115  ;;  %1141 = vrcp.f32 %v409_v14  ;;  %v411_v21 = vadd.f32 1.0, %v1114_v15 }
  0x2f   : > { %v1118_v22 = vpop.eup %1117  ;;  %1143 = vrcp.f32 %v410_v16  ;;  %v412_v23 = vadd.f32 1.0, %v1116_v17 }
  0x30   : > { %v1120_v27 = vpop.eup %1119  ;;  %1145 = vrcp.f32 %v411_v21  ;;  %v413_v28 = vadd.f32 1.0, %v1118_v22 }
  0x31   : > { %v1122_v29 = vpop.eup %1121  ;;  %1147 = vrcp.f32 %v412_v23  ;;  %v414_v30 = vadd.f32 1.0, %v1120_v27 }
  0x32   : > { %v1124_v31 = vpop.eup %1123  ;;  %1149 = vrcp.f32 %v413_v28  ;;  %v415_v32 = vadd.f32 1.0, %v1122_v29 }
  0x33   : > { %v1126_v33 = vpop.eup %1125  ;;  %1151 = vrcp.f32 %v414_v30  ;;  %v416_v35 = vadd.f32 1.0, %v1124_v31 }
  0x34   : > { %v1128_v36 = vpop.eup %1127  ;;  %1153 = vrcp.f32 %v415_v32  ;;  %v417_v37 = vadd.f32 1.0, %v1126_v33 }
  0x35   : > { %v1130_v39 = vpop.eup %1129  ;;  %1155 = vrcp.f32 %v416_v35  ;;  %v418_v40 = vadd.f32 1.0, %v1128_v36 }
  0x36   : > { %v1132_v41 = vpop.eup %1131  ;;  %1157 = vrcp.f32 %v417_v37  ;;  %v419_v42 = vadd.f32 1.0, %v1130_v39 }
  0x37   : > { %v1134_v43 = vpop.eup %1133  ;;  %1159 = vrcp.f32 %v418_v40  ;;  %v420_v45 = vadd.f32 1.0, %v1132_v41 }
  0x38   : > { %v1136_v48 = vpop.eup %1135  ;;  %v453_v51 = vmul.f32 %v1134_v43, %v1312_v18  ;;  %1161 = vrcp.f32 %v419_v42 }
  0x39   : > { %v1138_v52 = vpop.eup %1137  ;;  %v454_v53 = vmul.f32 %v1136_v48, %v1315_v19  ;;  %1163 = vrcp.f32 %v420_v45 }
  0x3a   : > { %v1140_v54 = vpop.eup %1139  ;;  %v476_v56 = vmul.f32 %v1397_v44, %v453_v51  ;;  %v455_v58 = vmul.f32 %v1138_v52, %v1318_v20 }
  0x3b   : > { %v1142_v59 = vpop.eup %1141  ;;  %v477_v60 = vmul.f32 %v1397_v44, %v454_v53  ;;  %v456_v61 = vmul.f32 %v1140_v54, %v1324_v24 }
  0x3c   : > { %v1144_v62 = vpop.eup %1143  ;;  %1033 = vmatprep.mubr.msk.f32.mxu0 %vm494_vm0, %v476_v56  ;;  %v478_v18 = vmul.f32 %v1397_v44, %v455_v58  ;;  %v457_v1 = vmul.f32 %v1142_v59, %v1327_v25 }
  0x3d   : > { %v1146_v4 = vpop.eup %1145  ;;  %1034 = vmatmul.mubr.msk.f32.vlgmr.msra.gmra.mxu0 %vm494_vm0, %v477_v60  ;;  %v479_v19 = vmul.f32 %v1397_v44, %v456_v61  ;;  %v458_v2 = vmul.f32 %v1144_v62, %v1330_v26 }
  0x3e   : > { %v1148_v20 = vpop.eup %1147  ;;  %1036 = vmatprep.mubr.msk.f32.mxu0 %vm494_vm0, %v478_v18  ;;  %v480_v5 = vmul.f32 %v1397_v44, %v457_v1  ;;  %v459_v24 = vmul.f32 %v1146_v4, %v1340_v34 }
  0x3f   : > { %v1150_v6 = vpop.eup %1149  ;;  %v481_v25 = vmul.f32 %v1397_v44, %v458_v2  ;;  %v460_v3 = vmul.f32 %v1148_v20, %v1346_v38 }
  0x40   : > { %v1152_v7 = vpop.eup %1151  ;;  %v461_v8 = vmul.f32 %v1150_v6, %v1356_v46  ;;  %v482_v11 = vmul.f32 %v1397_v44, %v459_v24 }
  0x41   : > { %v1154_v9 = vpop.eup %1153  ;;  %1037 = vmatmul.mubr.msk.f32.gmra.mxu0 %vm494_vm0, %v479_v19  ;;  %v462_v26 = vmul.f32 %v1152_v7, %v1359_v47  ;;  %v483_v17 = vmul.f32 %v1397_v44, %v460_v3 }
  0x42   : > { %v1156_v10 = vpop.eup %1155  ;;  %1039 = vmatprep.mubr.msk.f32.mxu0 %vm494_vm0, %v480_v5  ;;  %v484_v34 = vmul.f32 %v1397_v44, %v461_v8  ;;  %v463_v12 = vmul.f32 %v1154_v9, %v1363_v49 }
  0x43   : > { %v1158_v13 = vpop.eup %1157  ;;  %v485_v46 = vmul.f32 %v1397_v44, %v462_v26  ;;  %v464_v14 = vmul.f32 %v1156_v10, %v1366_v50 }
  0x44   : > { %v1160_v15 = vpop.eup %1159  ;;  %1045 = vmatprep.mubr.msk.f32.mxu1 %vm494_vm0, %v484_v34  ;;  %v486_v38 = vmul.f32 %v1397_v44, %v463_v12  ;;  %v465_v47 = vmul.f32 %v1158_v13, %v1373_v55 }
  0x45   : > { %v1162_v16 = vpop.eup %1161  ;;  %1040 = vmatmul.mubr.msk.f32.gmra.mxu0 %vm494_vm0, %v481_v25  ;;  %1046 = vmatmul.mubr.msk.f32.vlgmr.msra.gmra.mxu1 %vm494_vm0, %v485_v46  ;;  %v487_v49 = vmul.f32 %v1397_v44, %v464_v14  ;;  %v466_v21 = vmul.f32 %v1160_v15, %v1377_v57 }
  0x46   : > { %v1164_v50 = vpop.eup %1163  ;;  %1042 = vmatprep.mubr.msk.f32.mxu0 %vm494_vm0, %v482_v11  ;;  %1048 = vmatprep.mubr.msk.f32.mxu1 %vm494_vm0, %v486_v38  ;;  %v488_v22 = vmul.f32 %v1397_v44, %v465_v47  ;;  %v467_v55 = vmul.f32 %v1162_v16, %v1385_v63 }
  0x47   : > { %v489_v23 = vmul.f32 %v1397_v44, %v466_v21  ;;  %v468_v27 = vmul.f32 %v1164_v50, %v1388_v0 }
  0x48   : > { %v490_v57 = vmul.f32 %v1397_v44, %v467_v55 }
  0x49   : > { %1043 = vmatmul.mubr.msk.f32.gmra.mxu0 %vm494_vm0, %v483_v17  ;;  %1049 = vmatmul.mubr.msk.f32.gmra.mxu1 %vm494_vm0, %v487_v49  ;;  %v491_v28 = vmul.f32 %v1397_v44, %v468_v27 }
  0x4a   : > { %1051 = vmatprep.mubr.msk.f32.mxu1 %vm494_vm0, %v488_v22 }
  0x4d   : > { %1052 = vmatmul.mubr.msk.f32.gmra.mxu1 %vm494_vm0, %v489_v23 }
  0x4e   : > { %1054 = vmatprep.mubr.msk.f32.mxu1 %vm494_vm0, %v490_v57 }
  0x51   : > { %1055 = vmatmul.mubr.msk.f32.gmra.mxu1 %vm494_vm0, %v491_v28 }
  0xfd   : > { %v1454_v63 = vpop.f32.mrf.mxu0 }
  0xfe   : > { %690 = vst.msk [vmem:[%s1452_s27 + $0x8] sm:$0xff] %vm688_vm1, %v1454_v63  ;;  %v706_v31 = vsel %vm688_vm1, %v1454_v63, 0.0 }
  0xff   : > { %v1459_v0 = vpop.f32.mrf.mxu0 }
 0x100   : > { %689 = vst.msk [vmem:[%s1452_s27] sm:$0xff] %vm688_vm1, %v1459_v0  ;;  %v705_v29 = vsel %vm688_vm1, %v1459_v0, 0.0 }
 0x101   : > { %v1466_v30 = vpop.f32.mrf.mxu0  ;;  %v707_v32 = vadd.f32 %v706_v31, %v705_v29 }
 0x102   : > { %692 = vst.msk [vmem:[%s1452_s27 + $0x18] sm:$0xff] %vm688_vm1, %v1466_v30  ;;  %v710_v40 = vsel %vm688_vm1, %v1466_v30, 0.0 }
 0x103   : > { %v1473_v33 = vpop.f32.mrf.mxu0 }
 0x104   : > { %691 = vst.msk [vmem:[%s1452_s27 + $0x10] sm:$0xff] %vm688_vm1, %v1473_v33  ;;  %v708_v35 = vsel %vm688_vm1, %v1473_v33, 0.0 }
 0x105   : > { %v709_v36 = vadd.f32 %v708_v35, %v707_v32  ;;  %v1480_v37 = vpop.f32.mrf.mxu0  ;;  %v1482_v39 = vpop.f32.mrf.mxu1 }
 0x106   : > { %694 = vst.msk [vmem:[%s1452_s27 + $0x28] sm:$0xff] %vm688_vm1, %v1480_v37  ;;  %698 = vst.msk [vmem:[%s1452_s27 + $0x48] sm:$0xff] %vm688_vm1, %v1482_v39  ;;  %v714_v52 = vsel %vm688_vm1, %v1480_v37, 0.0  ;;  %v722_v2 = vsel %vm688_vm1, %v1482_v39, 0.0 }
 0x107   : > { %v1492_v41 = vpop.f32.mrf.mxu0  ;;  %v711_v42 = vadd.f32 %v710_v40, %v709_v36  ;;  %v1494_v43 = vpop.f32.mrf.mxu1 }
 0x108   : > { %693 = vst.msk [vmem:[%s1452_s27 + $0x20] sm:$0xff] %vm688_vm1, %v1492_v41  ;;  %v712_v44 = vsel %vm688_vm1, %v1492_v41, 0.0  ;;  %697 = vst.msk [vmem:[%s1452_s27 + $0x40] sm:$0xff] %vm688_vm1, %v1494_v43  ;;  %v720_v1 = vsel %vm688_vm1, %v1494_v43, 0.0 }
 0x109   : > { %v713_v45 = vadd.f32 %v712_v44, %v711_v42  ;;  %v1504_v48 = vpop.f32.mrf.mxu0  ;;  %v1506_v51 = vpop.f32.mrf.mxu1 }
 0x10a   : > { %696 = vst.msk [vmem:[%s1452_s27 + $0x38] sm:$0xff] %vm688_vm1, %v1504_v48  ;;  %700 = vst.msk [vmem:[%s1452_s27 + $0x58] sm:$0xff] %vm688_vm1, %v1506_v51  ;;  %v718_v61 = vsel %vm688_vm1, %v1504_v48, 0.0  ;;  %v726_v7 = vsel %vm688_vm1, %v1506_v51, 0.0 }
 0x10b   : > { %v639_v53 = vpop.f32.mrf.mxu0  ;;  %v715_v54 = vadd.f32 %v714_v52, %v713_v45  ;;  %v1516_v56 = vpop.f32.mrf.mxu1 }
 0x10c   : > { %695 = vst.msk [vmem:[%s1452_s27 + $0x30] sm:$0xff] %vm688_vm1, %v639_v53  ;;  %v716_v58 = vsel %vm688_vm1, %v639_v53, 0.0  ;;  %699 = vst.msk [vmem:[%s1452_s27 + $0x50] sm:$0xff] %vm688_vm1, %v1516_v56  ;;  %v724_v24 = vsel %vm688_vm1, %v1516_v56, 0.0 }
 0x10d   : > { %v717_v59 = vadd.f32 %v716_v58, %v715_v54  ;;  %v1524_v60 = vpop.f32.mrf.mxu1 }
 0x10e   : > { %702 = vst.msk [vmem:[%s1452_s27 + $0x68] sm:$0xff] %vm688_vm1, %v1524_v60  ;;  %v730_v3 = vsel %vm688_vm1, %v1524_v60, 0.0 }
 0x10f   : > { %v719_v62 = vadd.f32 %v718_v61, %v717_v59  ;;  %v1531_v18 = vpop.f32.mrf.mxu1 }
 0x110   : > { %701 = vst.msk [vmem:[%s1452_s27 + $0x60] sm:$0xff] %vm688_vm1, %v1531_v18  ;;  %v728_v9 = vsel %vm688_vm1, %v1531_v18, 0.0 }
 0x111   : > { %v721_v4 = vadd.f32 %v720_v1, %v719_v62  ;;  %v1538_v19 = vpop.f32.mrf.mxu1 }
 0x112   : > { %704 = vst.msk [vmem:[%s1452_s27 + $0x78] sm:$0xff] %vm688_vm1, %v1538_v19  ;;  %v734_v34 = vsel %vm688_vm1, %v1538_v19, 0.0 }
 0x113   : > { %v723_v20 = vadd.f32 %v722_v2, %v721_v4  ;;  %v1545_v5 = vpop.f32.mrf.mxu1 }
 0x114   : > { %703 = vst.msk [vmem:[%s1452_s27 + $0x70] sm:$0xff] %vm688_vm1, %v1545_v5  ;;  %v732_v10 = vsel %vm688_vm1, %v1545_v5, 0.0 }
 0x115   : > { %v725_v6 = vadd.f32 %v724_v24, %v723_v20 }
 0x117   : > { %v727_v8 = vadd.f32 %v726_v7, %v725_v6 }
 0x119   : > { %v729_v25 = vadd.f32 %v728_v9, %v727_v8 }
 0x11b   : > { %v731_v26 = vadd.f32 %v730_v3, %v729_v25 }
 0x11d   : > { %v733_v11 = vadd.f32 %v732_v10, %v731_v26 }
 0x11f   : > { %v735_v12 = vadd.f32 %v734_v34, %v733_v11 }
 0x121   : > { %v736_v13 = vrot.slane %v735_v12, 4 }
 0x123   : > { %v737_v46 = vadd.f32 %v736_v13, %v735_v12 }
 0x125   : > { %v738_v14 = vrot.slane %v737_v46, 2 }
 0x127   : > { %v739_v15 = vadd.f32 %v738_v14, %v737_v46 }
 0x129   : > { %v740_v38 = vrot.slane %v739_v15, 1 }
 0x12b   : > { %v741_v47 = vadd.f32 %v740_v38, %v739_v15 }
 0x12d   : > { %v742_v16 = vmul.f32 0.0078125, %v741_v47 }
 0x12f   : > { %v743_v17 = vsub.f32 %v1459_v0, %v742_v16  ;;  %v744_v49 = vsub.f32 %v1454_v63, %v742_v16  ;;  %760 = vst.msk [vmem:[%s1568_s8] sm:$0x1] %vm759_vm2, %v742_v16  ;;  %v745_v21 = vsub.f32 %v1473_v33, %v742_v16  ;;  %v746_v50 = vsub.f32 %v1466_v30, %v742_v16 }
 0x130   : > { %v747_v23 = vsub.f32 %v1492_v41, %v742_v16  ;;  %v748_v57 = vsub.f32 %v1480_v37, %v742_v16  ;;  %v749_v63 = vsub.f32 %v639_v53, %v742_v16  ;;  %v750_v30 = vsub.f32 %v1504_v48, %v742_v16 }
 0x131   : > { %v761_v22 = vmul.f32 %v743_v17, %v743_v17  ;;  %v762_v55 = vmul.f32 %v744_v49, %v744_v49  ;;  %v763_v27 = vmul.f32 %v745_v21, %v745_v21  ;;  %v764_v28 = vmul.f32 %v746_v50, %v746_v50 }
 0x132   : > { %v765_v32 = vmul.f32 %v747_v23, %v747_v23  ;;  %v766_v36 = vmul.f32 %v748_v57, %v748_v57  ;;  %v751_v42 = vsub.f32 %v1494_v43, %v742_v16  ;;  %v767_v37 = vmul.f32 %v749_v63, %v749_v63 }
 0x133   : > { %v777_v29 = vsel %vm688_vm1, %v761_v22, 0.0  ;;  %v778_v0 = vsel %vm688_vm1, %v762_v55, 0.0  ;;  %v780_v35 = vsel %vm688_vm1, %v763_v27, 0.0  ;;  %v782_v40 = vsel %vm688_vm1, %v764_v28, 0.0 }
 0x134   : > { %v779_v31 = vadd.f32 %v778_v0, %v777_v29  ;;  %v784_v44 = vsel %vm688_vm1, %v765_v32, 0.0  ;;  %v752_v52 = vsub.f32 %v1482_v39, %v742_v16  ;;  %v768_v54 = vmul.f32 %v750_v30, %v750_v30 }
 0x135   : > { %v786_v53 = vsel %vm688_vm1, %v766_v36, 0.0  ;;  %v753_v59 = vsub.f32 %v1516_v56, %v742_v16  ;;  %v769_v61 = vmul.f32 %v751_v42, %v751_v42  ;;  %v788_v48 = vsel %vm688_vm1, %v767_v37, 0.0 }
 0x136   : > { %v781_v33 = vadd.f32 %v780_v35, %v779_v31  ;;  %v754_v1 = vsub.f32 %v1506_v51, %v742_v16  ;;  %v770_v4 = vmul.f32 %v752_v52, %v752_v52  ;;  %v790_v43 = vsel %vm688_vm1, %v768_v54, 0.0 }
 0x137   : > { %v755_v20 = vsub.f32 %v1531_v18, %v742_v16  ;;  %v771_v24 = vmul.f32 %v753_v59, %v753_v59  ;;  %v792_v39 = vsel %vm688_vm1, %v769_v61, 0.0  ;;  %v756_v7 = vsub.f32 %v1524_v60, %v742_v16 }
 0x138   : > { %v783_v41 = vadd.f32 %v782_v40, %v781_v33  ;;  %v772_v8 = vmul.f32 %v754_v1, %v754_v1  ;;  %v794_v56 = vsel %vm688_vm1, %v770_v4, 0.0  ;;  %v757_v25 = vsub.f32 %v1545_v5, %v742_v16 }
 0x139   : > { %v773_v3 = vmul.f32 %v755_v20, %v755_v20  ;;  %v796_v51 = vsel %vm688_vm1, %v771_v24, 0.0  ;;  %v758_v10 = vsub.f32 %v1538_v19, %v742_v16  ;;  %v774_v11 = vmul.f32 %v756_v7, %v756_v7 }
 0x13a   : > { %v785_v45 = vadd.f32 %v784_v44, %v783_v41  ;;  %v798_v18 = vsel %vm688_vm1, %v772_v8, 0.0  ;;  %v775_v12 = vmul.f32 %v757_v25, %v757_v25 }
 0x13b   : > { %v800_v60 = vsel %vm688_vm1, %v773_v3, 0.0  ;;  %v776_v46 = vmul.f32 %v758_v10, %v758_v10  ;;  %v802_v14 = vsel %vm688_vm1, %v774_v11, 0.0 }
 0x13c   : > { %v787_v58 = vadd.f32 %v786_v53, %v785_v45  ;;  %v804_v5 = vsel %vm688_vm1, %v775_v12, 0.0 }
 0x13d   : > { %v806_v47 = vsel %vm688_vm1, %v776_v46, 0.0 }
 0x13e   : > { %v789_v62 = vadd.f32 %v788_v48, %v787_v58 }
 0x140   : > { %v791_v2 = vadd.f32 %v790_v43, %v789_v62 }
 0x142   : > { %v793_v6 = vadd.f32 %v792_v39, %v791_v2 }
 0x144   : > { %v795_v9 = vadd.f32 %v794_v56, %v793_v6 }
 0x146   : > { %v797_v26 = vadd.f32 %v796_v51, %v795_v9 }
 0x148   : > { %v799_v34 = vadd.f32 %v798_v18, %v797_v26 }
 0x14a   : > { %v801_v13 = vadd.f32 %v800_v60, %v799_v34 }
 0x14c   : > { %v803_v15 = vadd.f32 %v802_v14, %v801_v13 }
 0x14e   : > { %v805_v38 = vadd.f32 %v804_v5, %v803_v15 }
 0x150   : > { %v807_v17 = vadd.f32 %v806_v47, %v805_v38 }
 0x152   : > { %v808_v19 = vrot.slane %v807_v17, 4 }
 0x154   : > { %v809_v16 = vadd.f32 %v808_v19, %v807_v17 }
 0x156   : > { %v810_v49 = vrot.slane %v809_v16, 2 }
 0x158   : > { %v811_v21 = vadd.f32 %v810_v49, %v809_v16 }
 0x15a   : > { %v812_v50 = vrot.slane %v811_v21, 1 }
 0x15c   : > { %v813_v22 = vadd.f32 %v812_v50, %v811_v21 }
 0x15e   : > { %814 = vst.msk [vmem:[%s1568_s8 + $0x1] sm:$0x1] %vm759_vm2, %v813_v22 }
 0x15f PF: > { %s16_s22 = sadd.s32 1, %s1203_s22   ;;  %s1626_s18 = smov %s1195_s20 }
 0x160   : > { %p13_p8 = scmp.ge.s32.totalorder %s16_s22, 6   ;;  %s1627_s19 = smov %s1199_s21 }
 0x161   : > { %s1628_s20 = smov %s1631_s23  ;;  %s1629_s21 = smov %s1635_s24 }
 0x162   :  { %15 = sbr.rel (!%p13_p8) target bundleno = 3 (0x3), region = 81 }

</bundles_post_ra>
